<compile_context>
chip_gen: v5e
topology: v5e:2x2
jax: 0.10.0
libtpu: 0.0.40
codegen_flags: <defaults>
</compile_context>

<pallas_src>
import math

import jax
import jax.numpy as jnp
from jax import lax
from jax.experimental import pallas as pl
from jax.experimental.pallas import tpu as pltpu

INTERNAL_CODE_LEN = 8
LANE = 128
NEG_SLOPE = 0.2          # per spec: nn.LeakyReLU(negative_slope=0.2)


def _round_up(x, m):
    return (x + m - 1) // m * m


def _cdiv(a, b):
    return (a + b - 1) // b


def _device_kind():
    try:
        return jax.devices()[0].device_kind.lower()
    except Exception:
        return ""


def _default_act_dtype():
    kind = _device_kind()
    if "v6" in kind or "v7" in kind:
        return jnp.bfloat16          # bf16 VALU available
    return jnp.float32               # v5e etc.: no bf16 VPU -> keep f32 elementwise


def _num_tensorcores():
    return 2 if "v7" in _device_kind() else 1


# ----------------------------- Pallas kernel ------------------------------- #
def _make_dift_kernel(bias_slots, act_dtype):
    """bias_slots: static tuple of (offset, width) into the packed bias slab,
    ordered [b0..b3, b20_eff, b21..b25_padded]."""

    def kernel(x_ref, cs_ref,
               w0, w1, w2, w3, w4_20, w20cs, w21, w22, w23, w24, w25,
               b_ref, out_ref):

        def bias(i):
            off, n = bias_slots[i]
            return b_ref[:, off:off + n]            # static slice, (1, n) f32

        def lin(h, w_r, b):
            # bf16 x bf16 matmul on the MXU, f32 accumulation, f32 bias add.
            return jnp.dot(h.astype(w_r.dtype), w_r[...],
                           preferred_element_type=jnp.float32) + b

        def lrelu(h):
            # Single vmax form of LeakyReLU (exact for slope < 1); on v6e/v7x
            # run it in bf16 (packed vregs), which is also the matmul input dtype.
            h = h.astype(act_dtype)
            return jnp.maximum(h, NEG_SLOPE * h)

        # --- F.normalize(x, dim=1) via rsqrt (EUP) -------------------------- #
        x = x_ref[...]
        inv = lax.rsqrt(jnp.maximum(jnp.sum(x * x, axis=1, keepdims=True), 1e-24))
        x_n = x * inv

        # --- dift_part: m_len -> 128 -> 256 -> 128 -> 64 --------------------- #
        h = lrelu(lin(x_n, w0, bias(0)))
        h = lrelu(lin(h, w1, bias(1)))
        h = lrelu(lin(h, w2, bias(2)))
        h = lrelu(lin(h, w3, bias(3)))              # (TB, 64)

        # --- folded: (h@w4+b4) -> cat([code, cs, 1-cs]) @ W20 + b20 ---------- #
        #     == h @ (w4@w20a) + cs @ (w20b - w20c) + (b20 + colsum(w20c) + b4@w20a)
        cs = cs_ref[...]
        h2 = (jnp.dot(h.astype(w4_20.dtype), w4_20[...],
                      preferred_element_type=jnp.float32)
              + jnp.dot(cs.astype(w20cs.dtype), w20cs[...],
                        preferred_element_type=jnp.float32)
              + bias(4))
        h2 = lrelu(h2)

        # --- rest of dift_part2: 256 -> 512 -> 512 -> 256 -> 128 -> out_pad -- #
        h2 = lrelu(lin(h2, w21, bias(5)))
        h2 = lrelu(lin(h2, w22, bias(6)))
        h2 = lrelu(lin(h2, w23, bias(7)))
        h2 = lrelu(lin(h2, w24, bias(8)))
        out = lin(h2, w25, bias(9))                 # (TB, out_pad); pad cols == 0

        # --- F.normalize(out, dim=1); zero pad cols don't change row norm ---- #
        inv2 = lax.rsqrt(jnp.maximum(jnp.sum(out * out, axis=1, keepdims=True),
                                     1e-24))
        out_ref[...] = out * inv2

    return kernel


# ----------------------------- Parameter setup ----------------------------- #
def _init_linear(key, fan_in, fan_out):
    """Deterministic PyTorch-default-style init: U(-1/sqrt(fan_in), +)."""
    kw, kb = jax.random.split(key)
    bound = 1.0 / math.sqrt(fan_in)
    w = jax.random.uniform(kw, (fan_in, fan_out), jnp.float32, -bound, bound)
    b = jax.random.uniform(kb, (fan_out,), jnp.float32, -bound, bound)
    return w, b


def init_params(key, measurements_length, dift_code_len):
    d = dift_code_len
    dims1 = [measurements_length, 128, 256, 128, 64, INTERNAL_CODE_LEN]
    dims2 = [INTERNAL_CODE_LEN + 4, max(d, 256), max(d, 512), max(d, 512),
             max(d, 256), max(d, 128), d]
    n_layers = (len(dims1) - 1) + (len(dims2) - 1)
    keys = jax.random.split(key, n_layers)
    params, ki = [], 0
    for i in range(len(dims1) - 1):
        params.append(_init_linear(keys[ki], dims1[i], dims1[i + 1])); ki += 1
    for i in range(len(dims2) - 1):
        params.append(_init_linear(keys[ki], dims2[i], dims2[i + 1])); ki += 1
    return params                                   # [(w (in,out) f32, b (out,) f32)]


def pack_params(params, dift_code_len, weight_dtype=jnp.bfloat16):
    """Fold the linear code layer + the 1-cossin branch at pack time (in f32,
    before casting to bf16), pad the output layer to lane width, cast weights
    to bf16, and pack all biases into one lane-aligned f32 slab."""
    (w0, b0), (w1, b1), (w2, b2), (w3, b3), (w4, b4) = params[:5]
    (w20, b20), (w21, b21), (w22, b22), (w23, b23), (w24, b24), (w25, b25) = params[5:]

    # Split the first dift_part2 layer rows: [code(8) | cossin(2) | 1-cossin(2)].
    w20a = w20[:INTERNAL_CODE_LEN]
    w20b = w20[INTERNAL_CODE_LEN:INTERNAL_CODE_LEN + 2]
    w20c = w20[INTERNAL_CODE_LEN + 2:]
    w20cs = w20b - w20c                              # cossin coeff after folding

    # Fold the purely-linear internal-code layer into w20a (all in f32):
    #   (h @ w4 + b4) @ w20a = h @ (w4 @ w20a) + b4 @ w20a
    w4_20 = w4 @ w20a                                # (64, 256) f32
    b20_eff = b20 + jnp.sum(w20c, axis=0) + b4 @ w20a

    # Pad the final layer to a lane-dense output width (zeros -> exact result).
    out_pad = _round_up(dift_code_len, LANE)
    pad_n = out_pad - dift_code_len
    w25p = jnp.pad(w25, ((0, 0), (0, pad_n)))
    b25p = jnp.pad(b25, ((0, pad_n),))

    weights = [w.astype(weight_dtype)
               for w in (w0, w1, w2, w3, w4_20, w20cs, w21, w22, w23, w24, w25p)]

    biases = [b0, b1, b2, b3, b20_eff, b21, b22, b23, b24, b25p]
    slots, chunks, off = [], [], 0
    for b in biases:
        n = b.shape[0]
        slot_w = _round_up(n, LANE)                  # lane-aligned slot offsets
        slots.append((off, n))
        chunks.append(jnp.pad(b, ((0, slot_w - n),)))
        off += slot_w
    bias_slab = jnp.concatenate(chunks)[None, :].astype(jnp.float32)  # (1, total)

    return {"weights": weights, "bias": bias_slab,
            "bias_slots": tuple(slots), "out_pad": int(out_pad)}


# ------------------------------- Wrapper ------------------------------------ #
def dift_net_g_diff_global(batch_data, cossin, packed, measurements_length,
                           dift_code_len, block_b=512, act_dtype=None,
                           num_cores=None):
    """batch_data: (B, sample_view_num, m_len, 1) with sample_view_num*m_len ==
    measurements_length; cossin: (B, 2). Returns (B, dift_code_len) f32."""
    B = batch_data.shape[0]
    x = batch_data.reshape(B, measurements_length).astype(jnp.float32)
    cs = cossin.astype(jnp.float32)

    if act_dtype is None:
        act_dtype = _default_act_dtype()
    if num_cores is None:
        num_cores = _num_tensorcores()

    # Batch tile (multiple of 8 sublanes).  Large default tile amortizes the
    # per-grid-step overhead; on v7x cap the tile so grid >= 2 and both
    # TensorCores get a share of the ("parallel",) batch axis.
    b8 = _round_up(max(B, 1), 8)
    tb = _round_up(min(block_b, b8), 8)
    if num_cores > 1 and b8 >= 8 * num_cores:
        tb = min(tb, _round_up(_cdiv(b8, num_cores), 8))
    b_pad = _round_up(B, tb)
    if b_pad != B:
        x = jnp.pad(x, ((0, b_pad - B), (0, 0)))
        cs = jnp.pad(cs, ((0, b_pad - B), (0, 0)))

    weights = packed["weights"]
    bias = packed["bias"]
    out_pad = packed["out_pad"]
    kernel = _make_dift_kernel(packed["bias_slots"], act_dtype)

    def act_spec(feat):
        return pl.BlockSpec((tb, feat), lambda i: (i, 0))

    def fixed_spec(a):                               # VMEM-resident across steps
        return pl.BlockSpec(a.shape, lambda i: (0, 0))

    in_specs = ([act_spec(measurements_length), act_spec(2)]
                + [fixed_spec(w) for w in weights]
                + [fixed_spec(bias)])

    out = pl.pallas_call(
        kernel,
        out_shape=jax.ShapeDtypeStruct((b_pad, out_pad), jnp.float32),
        grid=(b_pad // tb,),
        in_specs=in_specs,
        out_specs=act_spec(out_pad),
        compiler_params=pltpu.CompilerParams(
            dimension_semantics=("parallel",)),
    )(x, cs, *weights, bias)

    return out[:B, :dift_code_len]


# ----------------------- Pure-JAX f32 reference (for check) ----------------- #
def dift_reference(batch_data, cossin, params, measurements_length):
    B = batch_data.shape[0]
    x = batch_data.reshape(B, measurements_length).astype(jnp.float32)
    x = x / jnp.maximum(jnp.linalg.norm(x, axis=1, keepdims=True), 1e-12)

    def lrelu(h):
        return jnp.where(h >= 0, h, NEG_SLOPE * h)

    h = x
    for i in range(4):
        w, b = params[i]
        h = lrelu(h @ w + b)
    w, b = params[4]
    code = h @ w + b
    cs = cossin.astype(jnp.float32)
    h2 = jnp.concatenate([code, cs, 1.0 - cs], axis=1)
    for i in range(5, 10):
        w, b = params[i]
        h2 = lrelu(h2 @ w + b)
    w, b = params[10]
    out = h2 @ w + b
    out = out / jnp.maximum(jnp.linalg.norm(out, axis=1, keepdims=True), 1e-12)
    return out


# --------------------------------- Main ------------------------------------- #
if __name__ == "__main__":
    batch_size = 8
    sample_view_num = 1
    measurements_length = 64
    dift_code_len = 32

    key = jax.random.PRNGKey(0)
    k_data, k_cs, k_params = jax.random.split(key, 3)

    batch_data = jax.random.normal(
        k_data, (batch_size, sample_view_num, measurements_length, 1), jnp.float32)
    cossin = jax.random.uniform(k_cs, (batch_size, 2), jnp.float32, -1.0, 1.0)

    raw_params = init_params(k_params, measurements_length, dift_code_len)
    packed = pack_params(raw_params, dift_code_len)

    out = dift_net_g_diff_global(batch_data, cossin, packed,
                                 measurements_length, dift_code_len)
    out = jax.block_until_ready(out)

    assert out.shape == (batch_size, dift_code_len)
    assert bool(jnp.all(jnp.isfinite(out)))
    # rows are L2-normalized
    assert bool(jnp.allclose(jnp.linalg.norm(out, axis=1), 1.0, atol=1e-4))
    # matches the f32 reference up to bf16-weight accumulation error
    ref = dift_reference(batch_data, cossin, raw_params, measurements_length)
    max_err = float(jnp.max(jnp.abs(out - ref)))
    assert max_err < 5e-2, f"max abs error vs f32 reference too large: {max_err}"
    print("KERNEL_OK")
</pallas_src>

<mosaic_0001>
module attributes {stable_mosaic.version = 11 : i64} {
  func.func @kernel(%arg0: i32, %arg1: memref<8x64xf32, #tpu.memory_space<vmem>>, %arg2: memref<8x2xf32, #tpu.memory_space<vmem>>, %arg3: memref<64x128xbf16, #tpu.memory_space<vmem>>, %arg4: memref<128x256xbf16, #tpu.memory_space<vmem>>, %arg5: memref<256x128xbf16, #tpu.memory_space<vmem>>, %arg6: memref<128x64xbf16, #tpu.memory_space<vmem>>, %arg7: memref<64x256xbf16, #tpu.memory_space<vmem>>, %arg8: memref<2x256xbf16, #tpu.memory_space<vmem>>, %arg9: memref<256x512xbf16, #tpu.memory_space<vmem>>, %arg10: memref<512x512xbf16, #tpu.memory_space<vmem>>, %arg11: memref<512x256xbf16, #tpu.memory_space<vmem>>, %arg12: memref<256x128xbf16, #tpu.memory_space<vmem>>, %arg13: memref<128x128xbf16, #tpu.memory_space<vmem>>, %arg14: memref<1x2432xf32, #tpu.memory_space<vmem>>, %arg15: memref<8x128xf32, #tpu.memory_space<vmem>>) attributes {dimension_semantics = [#tpu.dimension_semantics<parallel>], iteration_bounds = array<i64: 1>, scalar_prefetch = 0 : i64, scratch_operands = 0 : i64, tpu.core_type = #tpu.core_type<tc>, window_params = [{transform_indices = @transform_0, window_bounds = array<i64: 8, 64>}, {transform_indices = @transform_1, window_bounds = array<i64: 8, 2>}, {pipeline_mode = #tpu.pipeline_mode<synchronous>, transform_indices = @transform_2, window_bounds = array<i64: 64, 128>}, {pipeline_mode = #tpu.pipeline_mode<synchronous>, transform_indices = @transform_3, window_bounds = array<i64: 128, 256>}, {pipeline_mode = #tpu.pipeline_mode<synchronous>, transform_indices = @transform_4, window_bounds = array<i64: 256, 128>}, {pipeline_mode = #tpu.pipeline_mode<synchronous>, transform_indices = @transform_5, window_bounds = array<i64: 128, 64>}, {pipeline_mode = #tpu.pipeline_mode<synchronous>, transform_indices = @transform_6, window_bounds = array<i64: 64, 256>}, {pipeline_mode = #tpu.pipeline_mode<synchronous>, transform_indices = @transform_7, window_bounds = array<i64: 2, 256>}, {pipeline_mode = #tpu.pipeline_mode<synchronous>, transform_indices = @transform_8, window_bounds = array<i64: 256, 512>}, {pipeline_mode = #tpu.pipeline_mode<synchronous>, transform_indices = @transform_9, window_bounds = array<i64: 512, 512>}, {pipeline_mode = #tpu.pipeline_mode<synchronous>, transform_indices = @transform_10, window_bounds = array<i64: 512, 256>}, {pipeline_mode = #tpu.pipeline_mode<synchronous>, transform_indices = @transform_11, window_bounds = array<i64: 256, 128>}, {pipeline_mode = #tpu.pipeline_mode<synchronous>, transform_indices = @transform_12, window_bounds = array<i64: 128, 128>}, {pipeline_mode = #tpu.pipeline_mode<synchronous>, transform_indices = @transform_13, window_bounds = array<i64: 1, 2432>}, {transform_indices = @transform_14, window_bounds = array<i64: 8, 128>}]} {
    %c0 = arith.constant 0 : index
    %c0_0 = arith.constant 0 : index
    %0 = vector.load %arg1[%c0, %c0_0] : memref<8x64xf32, #tpu.memory_space<vmem>>, vector<8x64xf32>
    %1 = arith.mulf %0, %0 : vector<8x64xf32>
    %cst = arith.constant dense<0.000000e+00> : vector<8xf32>
    %2 = vector.multi_reduction <add>, %1, %cst [1] : vector<8x64xf32> to vector<8xf32>
    %3 = vector.shape_cast %2 : vector<8xf32> to vector<8x1xf32>
    %cst_1 = arith.constant 1.000000e-24 : f32
    %4 = vector.broadcast %cst_1 : f32 to vector<8x1xf32>
    %5 = arith.maximumf %3, %4 : vector<8x1xf32>
    %6 = math.rsqrt %5 : vector<8x1xf32>
    %7 = vector.broadcast %6 : vector<8x1xf32> to vector<8x64xf32>
    %8 = arith.mulf %0, %7 : vector<8x64xf32>
    %c0_2 = arith.constant 0 : index
    %c0_3 = arith.constant 0 : index
    %9 = vector.load %arg14[%c0_2, %c0_3] : memref<1x2432xf32, #tpu.memory_space<vmem>>, vector<1x128xf32>
    %10 = arith.truncf %8 : vector<8x64xf32> to vector<8x64xbf16>
    %c0_4 = arith.constant 0 : index
    %c0_5 = arith.constant 0 : index
    %11 = vector.load %arg3[%c0_4, %c0_5] : memref<64x128xbf16, #tpu.memory_space<vmem>>, vector<64x128xbf16>
    %cst_6 = arith.constant dense<0.000000e+00> : vector<8x128xf32>
    %12 = tpu.matmul %10, %11, %cst_6 {dimension_numbers = #tpu.dot_dimension_numbers<[1], [0], [0], [1], [0, 0, 1, 1], [], []>} : vector<8x64xbf16>, vector<64x128xbf16>, vector<8x128xf32> -> vector<8x128xf32>
    %13 = vector.broadcast %9 : vector<1x128xf32> to vector<8x128xf32>
    %14 = arith.addf %12, %13 : vector<8x128xf32>
    %cst_7 = arith.constant 2.000000e-01 : f32
    %15 = vector.broadcast %cst_7 : f32 to vector<8x128xf32>
    %16 = arith.mulf %15, %14 : vector<8x128xf32>
    %17 = arith.maximumf %14, %16 : vector<8x128xf32>
    %c0_8 = arith.constant 0 : index
    %c128 = arith.constant 128 : index
    %18 = vector.load %arg14[%c0_8, %c128] : memref<1x2432xf32, #tpu.memory_space<vmem>>, vector<1x256xf32>
    %19 = arith.truncf %17 : vector<8x128xf32> to vector<8x128xbf16>
    %c0_9 = arith.constant 0 : index
    %c0_10 = arith.constant 0 : index
    %20 = vector.load %arg4[%c0_9, %c0_10] : memref<128x256xbf16, #tpu.memory_space<vmem>>, vector<128x256xbf16>
    %cst_11 = arith.constant dense<0.000000e+00> : vector<8x256xf32>
    %21 = tpu.matmul %19, %20, %cst_11 {dimension_numbers = #tpu.dot_dimension_numbers<[1], [0], [0], [1], [0, 0, 1, 1], [], []>} : vector<8x128xbf16>, vector<128x256xbf16>, vector<8x256xf32> -> vector<8x256xf32>
    %22 = vector.broadcast %18 : vector<1x256xf32> to vector<8x256xf32>
    %23 = arith.addf %21, %22 : vector<8x256xf32>
    %cst_12 = arith.constant 2.000000e-01 : f32
    %24 = vector.broadcast %cst_12 : f32 to vector<8x256xf32>
    %25 = arith.mulf %24, %23 : vector<8x256xf32>
    %26 = arith.maximumf %23, %25 : vector<8x256xf32>
    %c0_13 = arith.constant 0 : index
    %c384 = arith.constant 384 : index
    %27 = vector.load %arg14[%c0_13, %c384] : memref<1x2432xf32, #tpu.memory_space<vmem>>, vector<1x128xf32>
    %28 = arith.truncf %26 : vector<8x256xf32> to vector<8x256xbf16>
    %c0_14 = arith.constant 0 : index
    %c0_15 = arith.constant 0 : index
    %29 = vector.load %arg5[%c0_14, %c0_15] : memref<256x128xbf16, #tpu.memory_space<vmem>>, vector<256x128xbf16>
    %cst_16 = arith.constant dense<0.000000e+00> : vector<8x128xf32>
    %30 = tpu.matmul %28, %29, %cst_16 {dimension_numbers = #tpu.dot_dimension_numbers<[1], [0], [0], [1], [0, 0, 1, 1], [], []>} : vector<8x256xbf16>, vector<256x128xbf16>, vector<8x128xf32> -> vector<8x128xf32>
    %31 = vector.broadcast %27 : vector<1x128xf32> to vector<8x128xf32>
    %32 = arith.addf %30, %31 : vector<8x128xf32>
    %cst_17 = arith.constant 2.000000e-01 : f32
    %33 = vector.broadcast %cst_17 : f32 to vector<8x128xf32>
    %34 = arith.mulf %33, %32 : vector<8x128xf32>
    %35 = arith.maximumf %32, %34 : vector<8x128xf32>
    %c0_18 = arith.constant 0 : index
    %c512 = arith.constant 512 : index
    %36 = vector.load %arg14[%c0_18, %c512] : memref<1x2432xf32, #tpu.memory_space<vmem>>, vector<1x64xf32>
    %37 = arith.truncf %35 : vector<8x128xf32> to vector<8x128xbf16>
    %c0_19 = arith.constant 0 : index
    %c0_20 = arith.constant 0 : index
    %38 = vector.load %arg6[%c0_19, %c0_20] : memref<128x64xbf16, #tpu.memory_space<vmem>>, vector<128x64xbf16>
    %cst_21 = arith.constant dense<0.000000e+00> : vector<8x64xf32>
    %39 = tpu.matmul %37, %38, %cst_21 {dimension_numbers = #tpu.dot_dimension_numbers<[1], [0], [0], [1], [0, 0, 1, 1], [], []>} : vector<8x128xbf16>, vector<128x64xbf16>, vector<8x64xf32> -> vector<8x64xf32>
    %40 = vector.broadcast %36 : vector<1x64xf32> to vector<8x64xf32>
    %41 = arith.addf %39, %40 : vector<8x64xf32>
    %cst_22 = arith.constant 2.000000e-01 : f32
    %42 = vector.broadcast %cst_22 : f32 to vector<8x64xf32>
    %43 = arith.mulf %42, %41 : vector<8x64xf32>
    %44 = arith.maximumf %41, %43 : vector<8x64xf32>
    %c0_23 = arith.constant 0 : index
    %c0_24 = arith.constant 0 : index
    %45 = vector.load %arg2[%c0_23, %c0_24] : memref<8x2xf32, #tpu.memory_space<vmem>>, vector<8x2xf32>
    %46 = arith.truncf %44 : vector<8x64xf32> to vector<8x64xbf16>
    %c0_25 = arith.constant 0 : index
    %c0_26 = arith.constant 0 : index
    %47 = vector.load %arg7[%c0_25, %c0_26] : memref<64x256xbf16, #tpu.memory_space<vmem>>, vector<64x256xbf16>
    %cst_27 = arith.constant dense<0.000000e+00> : vector<8x256xf32>
    %48 = tpu.matmul %46, %47, %cst_27 {dimension_numbers = #tpu.dot_dimension_numbers<[1], [0], [0], [1], [0, 0, 1, 1], [], []>} : vector<8x64xbf16>, vector<64x256xbf16>, vector<8x256xf32> -> vector<8x256xf32>
    %49 = arith.truncf %45 : vector<8x2xf32> to vector<8x2xbf16>
    %c0_28 = arith.constant 0 : index
    %c0_29 = arith.constant 0 : index
    %50 = vector.load %arg8[%c0_28, %c0_29] : memref<2x256xbf16, #tpu.memory_space<vmem>>, vector<2x256xbf16>
    %cst_30 = arith.constant dense<0.000000e+00> : vector<8x256xf32>
    %51 = tpu.matmul %49, %50, %cst_30 {dimension_numbers = #tpu.dot_dimension_numbers<[1], [0], [0], [1], [0, 0, 1, 1], [], []>} : vector<8x2xbf16>, vector<2x256xbf16>, vector<8x256xf32> -> vector<8x256xf32>
    %52 = arith.addf %48, %51 : vector<8x256xf32>
    %c0_31 = arith.constant 0 : index
    %c640 = arith.constant 640 : index
    %53 = vector.load %arg14[%c0_31, %c640] : memref<1x2432xf32, #tpu.memory_space<vmem>>, vector<1x256xf32>
    %54 = vector.broadcast %53 : vector<1x256xf32> to vector<8x256xf32>
    %55 = arith.addf %52, %54 : vector<8x256xf32>
    %cst_32 = arith.constant 2.000000e-01 : f32
    %56 = vector.broadcast %cst_32 : f32 to vector<8x256xf32>
    %57 = arith.mulf %56, %55 : vector<8x256xf32>
    %58 = arith.maximumf %55, %57 : vector<8x256xf32>
    %c0_33 = arith.constant 0 : index
    %c896 = arith.constant 896 : index
    %59 = vector.load %arg14[%c0_33, %c896] : memref<1x2432xf32, #tpu.memory_space<vmem>>, vector<1x512xf32>
    %60 = arith.truncf %58 : vector<8x256xf32> to vector<8x256xbf16>
    %c0_34 = arith.constant 0 : index
    %c0_35 = arith.constant 0 : index
    %61 = vector.load %arg9[%c0_34, %c0_35] : memref<256x512xbf16, #tpu.memory_space<vmem>>, vector<256x512xbf16>
    %cst_36 = arith.constant dense<0.000000e+00> : vector<8x512xf32>
    %62 = tpu.matmul %60, %61, %cst_36 {dimension_numbers = #tpu.dot_dimension_numbers<[1], [0], [0], [1], [0, 0, 1, 1], [], []>} : vector<8x256xbf16>, vector<256x512xbf16>, vector<8x512xf32> -> vector<8x512xf32>
    %63 = vector.broadcast %59 : vector<1x512xf32> to vector<8x512xf32>
    %64 = arith.addf %62, %63 : vector<8x512xf32>
    %cst_37 = arith.constant 2.000000e-01 : f32
    %65 = vector.broadcast %cst_37 : f32 to vector<8x512xf32>
    %66 = arith.mulf %65, %64 : vector<8x512xf32>
    %67 = arith.maximumf %64, %66 : vector<8x512xf32>
    %c0_38 = arith.constant 0 : index
    %c1408 = arith.constant 1408 : index
    %68 = vector.load %arg14[%c0_38, %c1408] : memref<1x2432xf32, #tpu.memory_space<vmem>>, vector<1x512xf32>
    %69 = arith.truncf %67 : vector<8x512xf32> to vector<8x512xbf16>
    %c0_39 = arith.constant 0 : index
    %c0_40 = arith.constant 0 : index
    %70 = vector.load %arg10[%c0_39, %c0_40] : memref<512x512xbf16, #tpu.memory_space<vmem>>, vector<512x512xbf16>
    %cst_41 = arith.constant dense<0.000000e+00> : vector<8x512xf32>
    %71 = tpu.matmul %69, %70, %cst_41 {dimension_numbers = #tpu.dot_dimension_numbers<[1], [0], [0], [1], [0, 0, 1, 1], [], []>} : vector<8x512xbf16>, vector<512x512xbf16>, vector<8x512xf32> -> vector<8x512xf32>
    %72 = vector.broadcast %68 : vector<1x512xf32> to vector<8x512xf32>
    %73 = arith.addf %71, %72 : vector<8x512xf32>
    %cst_42 = arith.constant 2.000000e-01 : f32
    %74 = vector.broadcast %cst_42 : f32 to vector<8x512xf32>
    %75 = arith.mulf %74, %73 : vector<8x512xf32>
    %76 = arith.maximumf %73, %75 : vector<8x512xf32>
    %c0_43 = arith.constant 0 : index
    %c1920 = arith.constant 1920 : index
    %77 = vector.load %arg14[%c0_43, %c1920] : memref<1x2432xf32, #tpu.memory_space<vmem>>, vector<1x256xf32>
    %78 = arith.truncf %76 : vector<8x512xf32> to vector<8x512xbf16>
    %c0_44 = arith.constant 0 : index
    %c0_45 = arith.constant 0 : index
    %79 = vector.load %arg11[%c0_44, %c0_45] : memref<512x256xbf16, #tpu.memory_space<vmem>>, vector<512x256xbf16>
    %cst_46 = arith.constant dense<0.000000e+00> : vector<8x256xf32>
    %80 = tpu.matmul %78, %79, %cst_46 {dimension_numbers = #tpu.dot_dimension_numbers<[1], [0], [0], [1], [0, 0, 1, 1], [], []>} : vector<8x512xbf16>, vector<512x256xbf16>, vector<8x256xf32> -> vector<8x256xf32>
    %81 = vector.broadcast %77 : vector<1x256xf32> to vector<8x256xf32>
    %82 = arith.addf %80, %81 : vector<8x256xf32>
    %cst_47 = arith.constant 2.000000e-01 : f32
    %83 = vector.broadcast %cst_47 : f32 to vector<8x256xf32>
    %84 = arith.mulf %83, %82 : vector<8x256xf32>
    %85 = arith.maximumf %82, %84 : vector<8x256xf32>
    %c0_48 = arith.constant 0 : index
    %c2176 = arith.constant 2176 : index
    %86 = vector.load %arg14[%c0_48, %c2176] : memref<1x2432xf32, #tpu.memory_space<vmem>>, vector<1x128xf32>
    %87 = arith.truncf %85 : vector<8x256xf32> to vector<8x256xbf16>
    %c0_49 = arith.constant 0 : index
    %c0_50 = arith.constant 0 : index
    %88 = vector.load %arg12[%c0_49, %c0_50] : memref<256x128xbf16, #tpu.memory_space<vmem>>, vector<256x128xbf16>
    %cst_51 = arith.constant dense<0.000000e+00> : vector<8x128xf32>
    %89 = tpu.matmul %87, %88, %cst_51 {dimension_numbers = #tpu.dot_dimension_numbers<[1], [0], [0], [1], [0, 0, 1, 1], [], []>} : vector<8x256xbf16>, vector<256x128xbf16>, vector<8x128xf32> -> vector<8x128xf32>
    %90 = vector.broadcast %86 : vector<1x128xf32> to vector<8x128xf32>
    %91 = arith.addf %89, %90 : vector<8x128xf32>
    %cst_52 = arith.constant 2.000000e-01 : f32
    %92 = vector.broadcast %cst_52 : f32 to vector<8x128xf32>
    %93 = arith.mulf %92, %91 : vector<8x128xf32>
    %94 = arith.maximumf %91, %93 : vector<8x128xf32>
    %c0_53 = arith.constant 0 : index
    %c2304 = arith.constant 2304 : index
    %95 = vector.load %arg14[%c0_53, %c2304] : memref<1x2432xf32, #tpu.memory_space<vmem>>, vector<1x128xf32>
    %96 = arith.truncf %94 : vector<8x128xf32> to vector<8x128xbf16>
    %c0_54 = arith.constant 0 : index
    %c0_55 = arith.constant 0 : index
    %97 = vector.load %arg13[%c0_54, %c0_55] : memref<128x128xbf16, #tpu.memory_space<vmem>>, vector<128x128xbf16>
    %cst_56 = arith.constant dense<0.000000e+00> : vector<8x128xf32>
    %98 = tpu.matmul %96, %97, %cst_56 {dimension_numbers = #tpu.dot_dimension_numbers<[1], [0], [0], [1], [0, 0, 1, 1], [], []>} : vector<8x128xbf16>, vector<128x128xbf16>, vector<8x128xf32> -> vector<8x128xf32>
    %99 = vector.broadcast %95 : vector<1x128xf32> to vector<8x128xf32>
    %100 = arith.addf %98, %99 : vector<8x128xf32>
    %101 = arith.mulf %100, %100 : vector<8x128xf32>
    %cst_57 = arith.constant dense<0.000000e+00> : vector<8xf32>
    %102 = vector.multi_reduction <add>, %101, %cst_57 [1] : vector<8x128xf32> to vector<8xf32>
    %103 = vector.shape_cast %102 : vector<8xf32> to vector<8x1xf32>
    %cst_58 = arith.constant 1.000000e-24 : f32
    %104 = vector.broadcast %cst_58 : f32 to vector<8x1xf32>
    %105 = arith.maximumf %103, %104 : vector<8x1xf32>
    %106 = math.rsqrt %105 : vector<8x1xf32>
    %107 = vector.broadcast %106 : vector<8x1xf32> to vector<8x128xf32>
    %108 = arith.mulf %100, %107 : vector<8x128xf32>
    %c0_59 = arith.constant 0 : index
    %c0_60 = arith.constant 0 : index
    %109 = vector.load %arg15[%c0_59, %c0_60] : memref<8x128xf32, #tpu.memory_space<vmem>>, vector<8x128xf32>
    tpu.vector_store %arg15[%c0_59, %c0_60], %108 {strides = array<i32>} : memref<8x128xf32, #tpu.memory_space<vmem>>, vector<8x128xf32>,
    return
  }
  func.func @transform_0(%arg0: i32) -> (i32, i32) {
    %c0_i32 = arith.constant 0 : i32
    %c0_i32_0 = arith.constant 0 : i32
    return %arg0, %c0_i32 : i32, i32
  }
  func.func @transform_1(%arg0: i32) -> (i32, i32) {
    %c0_i32 = arith.constant 0 : i32
    %c0_i32_0 = arith.constant 0 : i32
    return %arg0, %c0_i32 : i32, i32
  }
  func.func @transform_2(%arg0: i32) -> (i32, i32) {
    %c0_i32 = arith.constant 0 : i32
    %c0_i32_0 = arith.constant 0 : i32
    %c0_i32_1 = arith.constant 0 : i32
    return %c0_i32, %c0_i32_0 : i32, i32
  }
  func.func @transform_3(%arg0: i32) -> (i32, i32) {
    %c0_i32 = arith.constant 0 : i32
    %c0_i32_0 = arith.constant 0 : i32
    %c0_i32_1 = arith.constant 0 : i32
    return %c0_i32, %c0_i32_0 : i32, i32
  }
  func.func @transform_4(%arg0: i32) -> (i32, i32) {
    %c0_i32 = arith.constant 0 : i32
    %c0_i32_0 = arith.constant 0 : i32
    %c0_i32_1 = arith.constant 0 : i32
    return %c0_i32, %c0_i32_0 : i32, i32
  }
  func.func @transform_5(%arg0: i32) -> (i32, i32) {
    %c0_i32 = arith.constant 0 : i32
    %c0_i32_0 = arith.constant 0 : i32
    %c0_i32_1 = arith.constant 0 : i32
    return %c0_i32, %c0_i32_0 : i32, i32
  }
  func.func @transform_6(%arg0: i32) -> (i32, i32) {
    %c0_i32 = arith.constant 0 : i32
    %c0_i32_0 = arith.constant 0 : i32
    %c0_i32_1 = arith.constant 0 : i32
    return %c0_i32, %c0_i32_0 : i32, i32
  }
  func.func @transform_7(%arg0: i32) -> (i32, i32) {
    %c0_i32 = arith.constant 0 : i32
    %c0_i32_0 = arith.constant 0 : i32
    %c0_i32_1 = arith.constant 0 : i32
    return %c0_i32, %c0_i32_0 : i32, i32
  }
  func.func @transform_8(%arg0: i32) -> (i32, i32) {
    %c0_i32 = arith.constant 0 : i32
    %c0_i32_0 = arith.constant 0 : i32
    %c0_i32_1 = arith.constant 0 : i32
    return %c0_i32, %c0_i32_0 : i32, i32
  }
  func.func @transform_9(%arg0: i32) -> (i32, i32) {
    %c0_i32 = arith.constant 0 : i32
    %c0_i32_0 = arith.constant 0 : i32
    %c0_i32_1 = arith.constant 0 : i32
    return %c0_i32, %c0_i32_0 : i32, i32
  }
  func.func @transform_10(%arg0: i32) -> (i32, i32) {
    %c0_i32 = arith.constant 0 : i32
    %c0_i32_0 = arith.constant 0 : i32
    %c0_i32_1 = arith.constant 0 : i32
    return %c0_i32, %c0_i32_0 : i32, i32
  }
  func.func @transform_11(%arg0: i32) -> (i32, i32) {
    %c0_i32 = arith.constant 0 : i32
    %c0_i32_0 = arith.constant 0 : i32
    %c0_i32_1 = arith.constant 0 : i32
    return %c0_i32, %c0_i32_0 : i32, i32
  }
  func.func @transform_12(%arg0: i32) -> (i32, i32) {
    %c0_i32 = arith.constant 0 : i32
    %c0_i32_0 = arith.constant 0 : i32
    %c0_i32_1 = arith.constant 0 : i32
    return %c0_i32, %c0_i32_0 : i32, i32
  }
  func.func @transform_13(%arg0: i32) -> (i32, i32) {
    %c0_i32 = arith.constant 0 : i32
    %c0_i32_0 = arith.constant 0 : i32
    %c0_i32_1 = arith.constant 0 : i32
    return %c0_i32, %c0_i32_0 : i32, i32
  }
  func.func @transform_14(%arg0: i32) -> (i32, i32) {
    %c0_i32 = arith.constant 0 : i32
    %c0_i32_0 = arith.constant 0 : i32
    return %arg0, %c0_i32 : i32, i32
  }
}

</mosaic_0001>

<bundles_post_ra>
// kernel: tpu_custom_call.1
= control target key start
LH: loop header
LB: loop body
LE: loop exit
PB: predicated region body
PF: predicated region fallthrough
CT: control target
= control target key end

     0   :  { %19 = vsyncpa [#allocation3], 0  ;;  %s5328_s0 = inlined_call_operand.hbm [shape: f32[8,64], index: 0, kind: input, shape index: {}]   ;;  %s5329_s1 = inlined_call_operand.vmem [shape: f32[8,2], index: 1, kind: input, shape index: {}]   ;;  %s5330_s2 = inlined_call_operand.vmem [shape: bf16[64,128], index: 2, kind: input, shape index: {}]   ;;  %s5331_s3 = inlined_call_operand.hbm [shape: bf16[128,256], index: 3, kind: input, shape index: {}]   ;;  %s5332_s4 = inlined_call_operand.hbm [shape: bf16[256,128], index: 4, kind: input, shape index: {}]   ;;  %s5333_s5 = inlined_call_operand.vmem [shape: bf16[128,64], index: 5, kind: input, shape index: {}]   ;;  %s5334_s6 = inlined_call_operand.vmem [shape: bf16[64,256], index: 6, kind: input, shape index: {}]   ;;  %s5335_s7 = inlined_call_operand.hbm [shape: bf16[2,256], index: 7, kind: input, shape index: {}]   ;;  %s5336_s8 = inlined_call_operand.hbm [shape: bf16[256,512], index: 8, kind: input, shape index: {}]   ;;  %s5337_s9 = inlined_call_operand.hbm [shape: bf16[512,512], index: 9, kind: input, shape index: {}]   ;;  %s5338_s10 = inlined_call_operand.hbm [shape: bf16[512,256], index: 10, kind: input, shape index: {}]   ;;  %s5339_s11 = inlined_call_operand.hbm [shape: bf16[256,128], index: 11, kind: input, shape index: {}]   ;;  %s5340_s12 = inlined_call_operand.hbm [shape: bf16[128,128], index: 12, kind: input, shape index: {}]   ;;  %s5341_s13 = inlined_call_operand.vmem [shape: f32[1,2432], index: 13, kind: input, shape index: {}]   ;;  %s5342_s14 = inlined_call_operand.hbm [shape: f32[8,128], index: 14, kind: output, shape index: {}]  }
   0x1   :  { %20 = vsyncpa [#allocation6], 0 }
   0x2   :  { %21 = vsyncpa [#allocation9], 0 }
   0x3   :  { %22 = vsyncpa [#allocation12], 0 }
   0x4   :  { %23 = vsyncpa [#allocation15], 0  ;;  %s44_s15 = sshll.u32 %s5331_s3, 4  ;;  %s45_s15 = int_to_ptr.hbm [resolvable:$true] %s44_s15 }
   0x5   :  { %24 = vsyncpa [#allocation4], 0  ;;  %s5000_s16 = smov [#allocation5]   ;;  %s75_s20 = sshll.u32 %s5335_s7, 4  ;;  %s76_s20 = int_to_ptr.hbm [resolvable:$true] %s75_s20 }
   0x6   :  { %s46_s17 = sshll.u32 %s5000_s16, 4  ;;  %s5001_s21 = smov 128   ;;  %s47_s17 = int_to_ptr.vmem [resolvable:$true] %s46_s17 }
   0x7   :  { %s5002_s22 = smov 8   ;;  %s5003_s23 = smov [#allocation8]  }
   0x8   :  { %52 = dma.hbm_to_vmem [thread:$0]  %s45_s15, 2048, %s47_s17, [#allocation6], %s5001_s21, %s5001_s21, %s5002_s22  }
   0x9   :  { %s77_s24 = sshll.u32 %s5003_s23, 4  ;;  %s98_s26 = sshll.u32 %s5337_s9, 4  ;;  %s78_s24 = int_to_ptr.vmem [resolvable:$true] %s77_s24  ;;  %s99_s26 = int_to_ptr.hbm [resolvable:$true] %s98_s26 }
   0xa   :  { %80 = dma.hbm_to_vmem [thread:$0]  %s76_s20, 32, %s78_s24, [#allocation9]  }
   0xb   :  { %s5004_s27 = smov [#allocation11]   ;;  %s5005_s7 = smov 256  }
   0xc   :  { %s100_s28 = sshll.u32 %s5004_s27, 4  ;;  %s5006_s29 = smov 16   ;;  %s101_s28 = int_to_ptr.vmem [resolvable:$true] %s100_s28 }
   0xd   :  { %106 = dma.hbm_to_vmem [thread:$0]  %s99_s26, 16384, %s101_s28, [#allocation12], %s5005_s7, %s5005_s7, %s5006_s29  }
   0xe   :  { %s124_s16 = sshll.u32 %s5339_s11, 4  ;;  %s5007_s17 = smov [#allocation14]   ;;  %s125_s16 = int_to_ptr.hbm [resolvable:$true] %s124_s16 }
   0xf   :  { %s126_s18 = sshll.u32 %s5007_s17, 4  ;;  %s30_s9 = sshll.u32 %s5328_s0, 4  ;;  %s127_s18 = int_to_ptr.vmem [resolvable:$true] %s126_s18  ;;  %s31_s9 = int_to_ptr.hbm [resolvable:$true] %s30_s9 }
  0x10   :  { %s5008_s23 = smov 64   ;;  %s5009_s24 = smov 4  }
  0x11   :  { %132 = dma.hbm_to_vmem [thread:$0]  %s125_s16, 2048, %s127_s18, [#allocation15], %s5008_s23, %s5008_s23, %s5009_s24  }
  0x12   :  { %s57_s26 = sshll.u32 %s5332_s4, 4  ;;  %s5010_s11 = smov [#allocation2]   ;;  %s58_s26 = int_to_ptr.hbm [resolvable:$true] %s57_s26 }
  0x13   :  { %s32_s27 = sshll.u32 %s5010_s11, 4  ;;  %s5011_s28 = smov [#allocation7]   ;;  %s33_s27 = int_to_ptr.vmem [resolvable:$true] %s32_s27 }
  0x14   :  { %35 = dma.hbm_to_vmem [thread:$0]  %s31_s9, 128, %s33_s27, [#allocation3]  }
  0x15   :  { %s59_s30 = sshll.u32 %s5011_s28, 4  ;;  %s85_s17 = sshll.u32 %s5336_s8, 4  ;;  %s60_s30 = int_to_ptr.vmem [resolvable:$true] %s59_s30  ;;  %s86_s17 = int_to_ptr.hbm [resolvable:$true] %s85_s17 }
  0x16   :  { %65 = dma.hbm_to_vmem [thread:$0]  %s58_s26, 2048, %s60_s30, [#allocation6], %s5008_s23, %s5008_s23, %s5009_s24  }
  0x17   :  { %s111_s4 = sshll.u32 %s5338_s10, 4  ;;  %s5012_s19 = smov [#allocation10]   ;;  %s112_s4 = int_to_ptr.hbm [resolvable:$true] %s111_s4 }
  0x18   :  { %s87_s20 = sshll.u32 %s5012_s19, 4  ;;  %s5013_s9 = smov [#allocation13]   ;;  %s88_s20 = int_to_ptr.vmem [resolvable:$true] %s87_s20 }
  0x19   :  { %93 = dma.hbm_to_vmem [thread:$0]  %s86_s17, 8192, %s88_s20, [#allocation9], %s5005_s7, %s5005_s7, %s5006_s29  }
  0x1a   :  { %s113_s8 = sshll.u32 %s5013_s9, 4  ;;  %s137_s11 = sshll.u32 %s5340_s12, 4  ;;  %s114_s8 = int_to_ptr.vmem [resolvable:$true] %s113_s8  ;;  %s138_s11 = int_to_ptr.hbm [resolvable:$true] %s137_s11 }
  0x1b   :  { %119 = dma.hbm_to_vmem [thread:$0]  %s112_s4, 8192, %s114_s8, [#allocation12], %s5001_s21, %s5001_s21, %s5002_s22  }
  0x1c   :  { %s5014_s10 = smov [#allocation16]  }
  0x1d   :  { %s139_s26 = sshll.u32 %s5014_s10, 4  ;;  %s140_s26 = int_to_ptr.vmem [resolvable:$true] %s139_s26 }
  0x1e   :  { %145 = dma.hbm_to_vmem [thread:$0]  %s138_s11, 1024, %s140_s26, [#allocation15], %s5008_s23, %s5008_s23, %s5009_s24  }
  0x1f   :  { %4988 = dma.done.wait [#allocation3], 128  }
  0x20   :  { %4989 = vsyncadd [#allocation3], 4294967168 }
  0x21   :  { %4990 = dma.done.wait [#allocation6], 4096  }
  0x22   :  { %4991 = vsyncadd [#allocation6], 4294963200 }
  0x23   :  { %4992 = dma.done.wait [#allocation9], 8224  }
  0x24   :  { %4993 = vsyncadd [#allocation9], 4294959072 }
  0x25   :  { %4994 = dma.done.wait [#allocation12], 24576  }
  0x26   :  { %4995 = vsyncadd [#allocation12], 4294942720 }
  0x27   :  { %4996 = dma.done.wait [#allocation15], 3072  }
  0x28   :  { %4997 = vsyncadd [#allocation15], 4294964224  ;;  %v5139_v0 = vld [vmem:[#allocation2] sm:$0xff]  ;;  %vm187_vm0 = vcmask 523264   ;;  %v4394_v3 = vld [vmem:[%s5330_s2 + $0x18] sm:$0xff]  ;;  %vm657_vm4 = vcmask 1040384  }
  0x29   :  { %v186_v1 = vmul.f32 %v5139_v0, %v5139_v0  ;;  %247 = vmatpush.bf16.msra.mxu2 %v4394_v3  ;;  %v4393_v4 = vld [vmem:[%s5330_s2 + $0x10] sm:$0xff]  ;;  %v4392_v5 = vld [vmem:[%s5330_s2 + $0x8] sm:$0xff]  ;;  %v4391_v6 = vld [vmem:[%s5330_s2] sm:$0xff]  ;;  %vm653_vm5 = vcmask 15360   ;;  %s5015_s3 = smov [#allocation17]   ;;  %s3044_s10 = sshll.u32 %s5342_s14, 4  ;;  %s3045_s10 = int_to_ptr.hbm [resolvable:$true] %s3044_s10 }
  0x2a   :  { %v3133_v7 = vld [vmem:[#allocation5 + $0x70] sm:$0xf]  ;;  %v4410_v8 = vld [vmem:[#allocation5 + $0x74] sm:$0xf0]  ;;  %v4409_v9 = vld [vmem:[#allocation5 + $0x74] sm:$0xf] }
  0x2b   :  { %v188_v2 = vsel %vm187_vm0, %v186_v1, 0.0  ;;  %v3134_v10 = vor.u32 %v4410_v8, %v3133_v7  ;;  %v3135_v11 = vld [vmem:[#allocation5 + $0x78] sm:$0xf0]  ;;  %v3125_v12 = vld [vmem:[#allocation5 + $0x60] sm:$0xf]  ;;  %v4424_v7 = vld [vmem:[#allocation7 + $0x68] sm:$0xff] }
  0x2c   :  { %189 = vadd.xlane.f32.xlu0 %v188_v2  ;;  %v4408_v13 = vld [vmem:[#allocation5 + $0x64] sm:$0xf0]  ;;  %v3138_v14 = vor.u32 %v4409_v9, %v3135_v11  ;;  %v4407_v15 = vld [vmem:[#allocation5 + $0x64] sm:$0xf]  ;;  %v3127_v16 = vld [vmem:[#allocation5 + $0x68] sm:$0xf0] }
  0x2d   :  { %248 = vmatpush.bf16.msra.mxu2 %v4393_v4  ;;  %361 = vmatpush.bf16.msra.mxu1 %v3134_v10  ;;  %v3126_v17 = vor.u32 %v4408_v13, %v3125_v12  ;;  %v3130_v18 = vor.u32 %v4407_v15, %v3127_v16  ;;  %v3117_v19 = vld [vmem:[#allocation5 + $0x50] sm:$0xf]  ;;  %v4406_v20 = vld [vmem:[#allocation5 + $0x54] sm:$0xf0]  ;;  %v4405_v21 = vld [vmem:[#allocation5 + $0x54] sm:$0xf] }
  0x2e   :  { %v3119_v22 = vld [vmem:[#allocation5 + $0x58] sm:$0xf0]  ;;  %v3118_v24 = vor.u32 %v4406_v20, %v3117_v19  ;;  %v3109_v27 = vld [vmem:[#allocation5 + $0x40] sm:$0xf]  ;;  %v4404_v28 = vld [vmem:[#allocation5 + $0x44] sm:$0xf0] }
  0x2f   :  { %v3122_v26 = vor.u32 %v4405_v21, %v3119_v22  ;;  %v4403_v29 = vld [vmem:[#allocation5 + $0x44] sm:$0xf]  ;;  %v3111_v30 = vld [vmem:[#allocation5 + $0x48] sm:$0xf0]  ;;  %v3110_v31 = vor.u32 %v4404_v28, %v3109_v27  ;;  %v3101_v33 = vld [vmem:[#allocation5 + $0x30] sm:$0xf] }
  0x30   :  { %v3114_v32 = vor.u32 %v4403_v29, %v3111_v30  ;;  %v4402_v34 = vld [vmem:[#allocation5 + $0x34] sm:$0xf0]  ;;  %v4401_v35 = vld [vmem:[#allocation5 + $0x34] sm:$0xf]  ;;  %v3103_v36 = vld [vmem:[#allocation5 + $0x38] sm:$0xf0] }
  0x31   :  { %249 = vmatpush.bf16.msra.mxu2 %v4392_v5  ;;  %362 = vmatpush.bf16.msra.mxu1 %v3126_v17  ;;  %v3102_v37 = vor.u32 %v4402_v34, %v3101_v33  ;;  %v3106_v39 = vor.u32 %v4401_v35, %v3103_v36  ;;  %v3093_v40 = vld [vmem:[#allocation5 + $0x20] sm:$0xf]  ;;  %v4400_v41 = vld [vmem:[#allocation5 + $0x24] sm:$0xf0]  ;;  %v4399_v43 = vld [vmem:[#allocation5 + $0x24] sm:$0xf] }
  0x32   :  { %v3095_v44 = vld [vmem:[#allocation5 + $0x28] sm:$0xf0]  ;;  %v3094_v46 = vor.u32 %v4400_v41, %v3093_v40  ;;  %v3085_v54 = vld [vmem:[#allocation5 + $0x10] sm:$0xf]  ;;  %v4398_v55 = vld [vmem:[#allocation5 + $0x14] sm:$0xf0] }
  0x33   :  { %v3098_v47 = vor.u32 %v4399_v43, %v3095_v44  ;;  %v4397_v56 = vld [vmem:[#allocation5 + $0x14] sm:$0xf]  ;;  %v3086_v57 = vor.u32 %v4398_v55, %v3085_v54  ;;  %v3087_v58 = vld [vmem:[#allocation5 + $0x18] sm:$0xf0]  ;;  %v3077_v60 = vld [vmem:[#allocation5] sm:$0xf] }
  0x34   :  { %v3090_v59 = vor.u32 %v4397_v56, %v3087_v58  ;;  %v4396_v61 = vld [vmem:[#allocation5 + $0x4] sm:$0xf0]  ;;  %v4395_v62 = vld [vmem:[#allocation5 + $0x4] sm:$0xf]  ;;  %v3079_v1 = vld [vmem:[#allocation5 + $0x8] sm:$0xf0] }
  0x35   :  { %250 = vmatpush.bf16.msra.mxu2 %v4391_v6  ;;  %363 = vmatpush.bf16.msra.mxu1 %v3118_v24  ;;  %v3078_v63 = vor.u32 %v4396_v61, %v3077_v60  ;;  %v3082_v2 = vor.u32 %v4395_v62, %v3079_v1  ;;  %v4426_v3 = vld [vmem:[#allocation7 + $0x78] sm:$0xff]  ;;  %v4417_v4 = vld [vmem:[#allocation7 + $0x30] sm:$0xff]  ;;  %v4416_v6 = vld [vmem:[#allocation7 + $0x28] sm:$0xff]  ;;  %s3042_s25 = sshll.u32 %s5015_s3, 4  ;;  %s3043_s25 = int_to_ptr.vmem [resolvable:$true] %s3042_s25 }
  0x36   :  { %538 = vmatpush.bf16.msra.mxu0 %v4426_v3  ;;  %v4425_v5 = vld [vmem:[#allocation7 + $0x70] sm:$0xff]  ;;  %v4415_v8 = vld [vmem:[#allocation7 + $0x20] sm:$0xff]  ;;  %v4414_v10 = vld [vmem:[#allocation7 + $0x18] sm:$0xff] }
  0x37   :  { %v4423_v9 = vld [vmem:[#allocation7 + $0x60] sm:$0xff]  ;;  %v4413_v11 = vld [vmem:[#allocation7 + $0x10] sm:$0xff]  ;;  %v4422_v19 = vld [vmem:[#allocation7 + $0x58] sm:$0xff] }
  0x38   :  { %v4739_v12 = vld [vmem:[%s5341_s13] ss:$0 sm:$0xff]  ;;  %v4412_v20 = vld [vmem:[#allocation7 + $0x8] sm:$0xff]  ;;  %v4411_v22 = vld [vmem:[#allocation7] sm:$0xff] }
  0x39   :  { %374 = vmatpush.bf16.msrb.mxu2 %v3138_v14  ;;  %364 = vmatpush.bf16.msra.mxu1 %v3110_v31  ;;  %v4421_v21 = vld [vmem:[#allocation7 + $0x50] sm:$0xff]  ;;  %v4419_v24 = vld [vmem:[#allocation7 + $0x40] sm:$0xff]  ;;  %v4432_v27 = vld [vmem:[%s5333_s5 + $0x28] sm:$0xff] }
  0x3a   :  { %539 = vmatpush.bf16.msra.mxu0 %v4425_v5  ;;  %v4431_v28 = vld [vmem:[%s5333_s5 + $0x20] sm:$0xff]  ;;  %v4430_v31 = vld [vmem:[%s5333_s5 + $0x18] sm:$0xff]  ;;  %v4441_v54 = vld [vmem:[%s5334_s6 + $0x34] sm:$0xf] }
  0x3b   :  { %v258_v29 = vld [vmem:[%s5341_s13 + $0x1] sm:$0x3]  ;;  %v3265_v55 = vld [vmem:[%s5334_s6 + $0x38] sm:$0xf0]  ;;  %v3257_v62 = vld [vmem:[%s5334_s6 + $0x28] sm:$0xf0] }
  0x3c   :  { %v277_v30 = vperm.slane %v258_v29, 0  ;;  %v278_v35 = vperm.slane %v258_v29, 1  ;;  %v3268_v58 = vor.u32 %v4441_v54, %v3265_v55  ;;  %v4740_v3 = vld [vmem:[%s5341_s13 + $0x3] ss:$0 sm:$0xff]  ;;  %v3387_v29 = vld [vmem:[#allocation10 + $0xf0] sm:$0xf0] }
  0x3d   :  { %375 = vmatpush.bf16.msrb.mxu2 %v3130_v18  ;;  %365 = vmatpush.bf16.msra.mxu1 %v3102_v37  ;;  %v3337_v54 = vld [vmem:[#allocation10 + $0x80] sm:$0xf]  ;;  %v4461_v55 = vld [vmem:[#allocation10 + $0x8c] sm:$0xf0] }
  0x3e   :  { %540 = vmatpush.bf16.msra.mxu0 %v4424_v7 }
  0x41   :  { %376 = vmatpush.bf16.msrb.mxu2 %v3122_v26  ;;  %366 = vmatpush.bf16.msra.mxu1 %v3094_v46  ;;  %v4433_v26 = vld [vmem:[%s5333_s5 + $0x30] sm:$0xff]  ;;  %v4428_v46 = vld [vmem:[%s5333_s5 + $0x8] sm:$0xff] }
  0x42   :  { %541 = vmatpush.bf16.msra.mxu0 %v4423_v9 }
  0x45   :  { %377 = vmatpush.bf16.msrb.mxu2 %v3114_v32  ;;  %367 = vmatpush.bf16.msra.mxu1 %v3086_v57  ;;  %v637_v57 = vld [vmem:[%s5329_s1] sm:$0xff] }
  0x46   :  { %542 = vmatpush.bf16.msra.mxu0 %v4422_v19  ;;  %v647_v1 = vpack.c.bf16 %v637_v57, %v637_v57  ;;  %v3239_v19 = vld [vmem:[%s5334_s6] sm:$0xf]  ;;  %v3481_v57 = vld [vmem:[#allocation10 + $0x1a0] sm:$0xf] }
  0x49   :  { %378 = vmatpush.bf16.msrb.mxu2 %v3106_v39  ;;  %368 = vmatpush.bf16.msra.mxu1 %v3078_v63 }
  0x4a   :  { %543 = vmatpush.bf16.msra.mxu0 %v4421_v21  ;;  %v4435_v21 = vld [vmem:[%s5334_s6 + $0x4] sm:$0xf] }
  0x4d   :  { %379 = vmatpush.bf16.msrb.mxu2 %v3098_v47  ;;  %v4427_v47 = vld [vmem:[%s5333_s5] sm:$0xff] }
  0x51   :  { %380 = vmatpush.bf16.msrb.mxu2 %v3090_v59  ;;  %v4439_v59 = vld [vmem:[%s5334_s6 + $0x24] sm:$0xf] }
  0x55   :  { %381 = vmatpush.bf16.msrb.mxu2 %v3082_v2 }
  0x9f   :  { %v190_v23 = vpop.xlane.xlu0 %189 }
  0xa0   :  { %v191_v25 = vmax.f32 %v190_v23, 1e-24  ;;  %v4420_v23 = vld [vmem:[#allocation7 + $0x48] sm:$0xff] }
  0xa1   :  { %544 = vmatpush.bf16.msra.mxu0 %v4420_v23  ;;  %v3241_v23 = vld [vmem:[%s5334_s6 + $0x8] sm:$0xf0] }
  0xa2   :  { %4744 = vrsqrt.f32 %v191_v25  ;;  %vm198_vm2 = vweird.f32 %v191_v25 }
  0xa5   :  { %545 = vmatpush.bf16.msra.mxu0 %v4419_v24  ;;  %v3244_v24 = vor.u32 %v4435_v21, %v3241_v23  ;;  %v3305_v21 = vld [vmem:[#allocation10 + $0x40] sm:$0xf]  ;;  %v4451_v23 = vld [vmem:[#allocation10 + $0x44] sm:$0xf] }
  0xa8   :  { %v4745_v38 = vpop.eup %4744 }
  0xa9   :  { %v193_v42 = vmul.f32 %v4745_v38, %v191_v25  ;;  %vm199_vm1 = vweird.f32 %v4745_v38  ;;  %v4434_v25 = vld [vmem:[%s5333_s5 + $0x38] sm:$0xff] }
  0xaa   :  { %vm200_vm3 = vmor %vm198_vm2, %vm199_vm1  ;;  %622 = vmatpush.bf16.msrb.mxu1 %v4434_v25  ;;  %v3385_v25 = vld [vmem:[#allocation10 + $0xe0] sm:$0xf] }
  0xab   :  { %v194_v45 = vmul.f32 %v4745_v38, %v193_v42 }
  0xad   :  { %v195_v48 = vmul.f32 0.5, %v194_v45  ;;  %v4429_v45 = vld [vmem:[%s5333_s5 + $0x10] sm:$0xff] }
  0xae   :  { %623 = vmatpush.bf16.msrb.mxu1 %v4433_v26  ;;  %v4473_v26 = vld [vmem:[#allocation10 + $0xec] sm:$0xf0] }
  0xaf   :  { %v196_v49 = vsub.f32 1.5, %v195_v48  ;;  %v648_v48 = vld [vmem:[#allocation8] sm:$0x3] }
  0xb0   :  { %650 = vst [vmem:[#allocation1] ss:$9 sm:$0xff] %v648_v48  ;;  %v4501_v48 = vld [vmem:[#allocation10 + $0x1cc] sm:$0xf0] }
  0xb1   :  { %v197_v50 = vmul.f32 %v4745_v38, %v196_v49  ;;  %v3263_v49 = vld [vmem:[%s5334_s6 + $0x30] sm:$0xf] }
  0xb2   :  { %624 = vmatpush.bf16.msrb.mxu1 %v4432_v27  ;;  %v4471_v27 = vld [vmem:[#allocation10 + $0xe4] sm:$0xf] }
  0xb3   :  { %v201_v51 = vsel %vm200_vm3, %v4745_v38, %v197_v50  ;;  %v4442_v50 = vld [vmem:[%s5334_s6 + $0x34] sm:$0xf0] }
  0xb4   :  { %v202_v52 = vmul.f32 %v201_v51, %v5139_v0  ;;  %v4418_v0 = vld [vmem:[#allocation7 + $0x38] sm:$0xff]  ;;  %v3264_v51 = vor.u32 %v4442_v50, %v3263_v49  ;;  %v4499_v50 = vld [vmem:[#allocation10 + $0x1c4] sm:$0xf] }
  0xb5   :  { %525 = vmatpush.bf16.msra.mxu3 %v4418_v0  ;;  %v3260_v0 = vor.u32 %v4439_v59, %v3257_v62  ;;  %v4495_v59 = vld [vmem:[#allocation10 + $0x1a4] sm:$0xf]  ;;  %v3483_v62 = vld [vmem:[#allocation10 + $0x1b0] sm:$0xf0] }
  0xb6   :  { %v204_v53 = vpack.c.bf16 %v202_v52, %v202_v52  ;;  %625 = vmatpush.bf16.msrb.mxu1 %v4431_v28  ;;  %v3255_v52 = vld [vmem:[%s5334_s6 + $0x20] sm:$0xf]  ;;  %735 = vmatpush.bf16.msrb.mxu0 %v3264_v51  ;;  %v3386_v28 = vor.u32 %v4473_v26, %v3385_v25  ;;  %v3499_v51 = vld [vmem:[#allocation10 + $0x1d0] sm:$0xf0] }
  0xb7   :  { %v651_v60 = vld [vmem:[#allocation1] sm:$0xff]  ;;  %v652_v61 = vld [vmem:[#allocation1 + $0x9] sm:$0xff] }
  0xb8   :  { %3074 = vmatmul.msk.bf16.vlgmr.msra.gmra.mxu2 %vm187_vm0, %v204_v53  ;;  %v4440_v53 = vld [vmem:[%s5334_s6 + $0x24] sm:$0xf0]  ;;  %v658_v63 = vsel %vm657_vm4, %v651_v60, 0  ;;  %v660_v2 = vsel %vm657_vm4, %v652_v61, 0  ;;  %v4459_v60 = vld [vmem:[#allocation10 + $0x84] sm:$0xf] }
  0xb9   :  { %526 = vmatpush.bf16.msra.mxu3 %v4417_v4  ;;  %v3256_v56 = vor.u32 %v4440_v53, %v3255_v52  ;;  %669 = vmatpush.bf16.msra.mxu2 %v658_v63  ;;  %v3502_v53 = vor.u32 %v4499_v50, %v3499_v51  ;;  %v3339_v61 = vld [vmem:[#allocation10 + $0x90] sm:$0xf0]  ;;  %v3273_v50 = vld [vmem:[#allocation10] sm:$0xf]  ;;  %v4445_v51 = vld [vmem:[#allocation10 + $0xc] sm:$0xf0] }
  0xba   :  { %626 = vmatpush.bf16.msrb.mxu1 %v4430_v31  ;;  %v4469_v31 = vld [vmem:[#allocation10 + $0xcc] sm:$0xf0] }
  0xbb   :  { %736 = vmatpush.bf16.msrb.mxu0 %v3256_v56 }
  0xbd   :  { %527 = vmatpush.bf16.msra.mxu3 %v4416_v6 }
  0xbe   :  { %627 = vmatpush.bf16.msrb.mxu1 %v4429_v45  ;;  %v4463_v45 = vld [vmem:[#allocation10 + $0xa4] sm:$0xf] }
  0xc1   :  { %528 = vmatpush.bf16.msra.mxu3 %v4415_v8 }
  0xc2   :  { %628 = vmatpush.bf16.msrb.mxu1 %v4428_v46  ;;  %v3355_v46 = vld [vmem:[#allocation10 + $0xb0] sm:$0xf0] }
  0xc3   :  { %v3358_v56 = vor.u32 %v4463_v45, %v3355_v46  ;;  %v4481_v45 = vld [vmem:[#allocation10 + $0x12c] sm:$0xf0]  ;;  %v4479_v46 = vld [vmem:[#allocation10 + $0x124] sm:$0xf] }
  0xc5   :  { %529 = vmatpush.bf16.msra.mxu3 %v4414_v10 }
  0xc6   :  { %629 = vmatpush.bf16.msrb.mxu1 %v4427_v47  ;;  %v3497_v47 = vld [vmem:[#allocation10 + $0x1c0] sm:$0xf] }
  0xc7   :  { %v3498_v49 = vor.u32 %v4501_v48, %v3497_v47  ;;  %v3419_v47 = vld [vmem:[#allocation10 + $0x130] sm:$0xf0] }
  0xc9   :  { %530 = vmatpush.bf16.msra.mxu3 %v4413_v11 }
  0xcd   :  { %531 = vmatpush.bf16.msra.mxu3 %v4412_v20  ;;  %v4436_v20 = vld [vmem:[%s5334_s6 + $0x4] sm:$0xf0] }
  0xd1   :  { %532 = vmatpush.bf16.msra.mxu3 %v4411_v22  ;;  %v3240_v22 = vor.u32 %v4436_v20, %v3239_v19  ;;  %v3451_v19 = vld [vmem:[#allocation10 + $0x170] sm:$0xf0] }
  0xd5   :  { %682 = vmatpush.bf16.msrb.mxu3 %v660_v2 }
 0x13b   :  { %v252_v13 = vpop.f32.mrf.mxu2 }
 0x13c   :  { %v253_v14 = vadd.f32 %v4739_v12, %v252_v13  ;;  %v3247_v13 = vld [vmem:[%s5334_s6 + $0x10] sm:$0xf] }
 0x13e   :  { %v256_v15 = vmul.f32 0.2, %v253_v14 }
 0x140   :  { %v257_v16 = vmax.f32 %v253_v14, %v256_v15  ;;  %v4438_v14 = vld [vmem:[%s5334_s6 + $0x14] sm:$0xf0]  ;;  %v4437_v15 = vld [vmem:[%s5334_s6 + $0x14] sm:$0xf] }
 0x142   :  { %v259_v17 = vpack.c.bf16 %v257_v16, %v257_v16  ;;  %v3248_v16 = vor.u32 %v4438_v14, %v3247_v13 }
 0x143   :  { %v254_v18 = vpop.f32.mrf.mxu2 }
 0x144   :  { %369 = vmatmul.bf16.vlgmr.msra.gmra.mxu1 %v259_v17  ;;  %382 = vmatmul.bf16.vlgmr.msrb.gmra.mxu2 %v259_v17  ;;  %v3249_v17 = vld [vmem:[%s5334_s6 + $0x18] sm:$0xf0] }
 0x145   :  { %748 = vmatpush.bf16.msrb.mxu2 %v3268_v58  ;;  %v3252_v18 = vor.u32 %v4437_v15, %v3249_v17  ;;  %737 = vmatpush.bf16.msrb.mxu0 %v3248_v16  ;;  %v4497_v58 = vld [vmem:[#allocation10 + $0x1ac] sm:$0xf0]  ;;  %v3449_v15 = vld [vmem:[#allocation10 + $0x160] sm:$0xf] }
 0x146   :  { %v3482_v63 = vor.u32 %v4497_v58, %v3481_v57  ;;  %v4489_v17 = vld [vmem:[#allocation10 + $0x16c] sm:$0xf0]  ;;  %v3422_v58 = vor.u32 %v4479_v46, %v3419_v47  ;;  %v3491_v46 = vld [vmem:[#allocation10 + $0x1b8] sm:$0xf0] }
 0x147   :  { %v3450_v25 = vor.u32 %v4489_v17, %v3449_v15  ;;  %v4475_v15 = vld [vmem:[#allocation10 + $0x104] sm:$0xf]  ;;  %v3521_v17 = vld [vmem:[#allocation10 + $0x1e8] sm:$0xf] }
 0x149   :  { %749 = vmatpush.bf16.msrb.mxu2 %v3260_v0  ;;  %738 = vmatpush.bf16.msrb.mxu0 %v3240_v22  ;;  %v3465_v0 = vld [vmem:[#allocation10 + $0x180] sm:$0xf]  ;;  %v4453_v22 = vld [vmem:[#allocation10 + $0x4c] sm:$0xf0] }
 0x14d   :  { %750 = vmatpush.bf16.msrb.mxu2 %v3252_v18  ;;  %v4487_v18 = vld [vmem:[#allocation10 + $0x164] sm:$0xf] }
 0x14e   :  { %v3454_v26 = vor.u32 %v4487_v18, %v3451_v19  ;;  %v4506_v19 = vld [vmem:[#allocation10 + $0x1f4] sm:$0xf0] }
 0x151   :  { %751 = vmatpush.bf16.msrb.mxu2 %v3244_v24  ;;  %v3307_v24 = vld [vmem:[#allocation10 + $0x50] sm:$0xf0] }
 0x154   :  { %3235 = vmatmul.msk.bf16.vlgmr.msra.gmra.mxu2 %vm653_vm5, %v647_v1 }
 0x1c1   :  { %v370_v32 = vpop.f32.mrf.mxu1 }
 0x1c2   :  { %v371_v33 = vadd.f32 %v370_v32, %v277_v30  ;;  %v3369_v30 = vld [vmem:[#allocation10 + $0xc0] sm:$0xf]  ;;  %v3390_v32 = vor.u32 %v4471_v27, %v3387_v29 }
 0x1c4   :  { %v387_v34 = vmul.f32 0.2, %v371_v33  ;;  %1191 = vmatpush.bf16.msra.mxu1 %v3390_v32  ;;  %v4483_v32 = vld [vmem:[#allocation10 + $0x144] sm:$0xf] }
 0x1c6   :  { %v389_v36 = vmax.f32 %v371_v33, %v387_v34  ;;  %v4467_v33 = vld [vmem:[#allocation10 + $0xc4] sm:$0xf]  ;;  %v3371_v34 = vld [vmem:[#allocation10 + $0xd0] sm:$0xf0] }
 0x1c7   :  { %v383_v37 = vpop.f32.mrf.mxu2 }
 0x1c8   :  { %v384_v38 = vadd.f32 %v383_v37, %v278_v35  ;;  %v392_v39 = vpack.c.bf16 %v389_v36, %v389_v36  ;;  %v3513_v35 = vld [vmem:[#allocation10 + $0x1e0] sm:$0xf]  ;;  %v3370_v36 = vor.u32 %v4469_v31, %v3369_v30  ;;  %v4505_v37 = vld [vmem:[#allocation10 + $0x1ec] sm:$0xf0]  ;;  %v3306_v30 = vor.u32 %v4453_v22, %v3305_v21  ;;  %v3523_v22 = vld [vmem:[#allocation10 + $0x1f8] sm:$0xf0] }
 0x1c9   :  { %v372_v40 = vpop.f32.mrf.mxu1  ;;  %v4485_v31 = vld [vmem:[#allocation10 + $0x14c] sm:$0xf0]  ;;  %v3522_v21 = vor.u32 %v4506_v19, %v3521_v17  ;;  %v4484_v19 = vld [vmem:[#allocation10 + $0x14c] sm:$0xf] }
 0x1ca   :  { %v388_v41 = vmul.f32 0.2, %v384_v38  ;;  %533 = vmatmul.bf16.vlgmr.msra.gmra.mxu3 %v392_v39  ;;  %v3515_v39 = vld [vmem:[#allocation10 + $0x1f0] sm:$0xf0]  ;;  %v3374_v40 = vor.u32 %v4467_v33, %v3371_v34  ;;  %v4741_v34 = vld [vmem:[%s5341_s13 + $0x4] ss:$0 sm:$0xff] }
 0x1cb   :  { %1165 = vmatpush.bf16.msra.mxu3 %v3386_v28  ;;  %v3433_v28 = vld [vmem:[#allocation10 + $0x140] sm:$0xf]  ;;  %v3435_v33 = vld [vmem:[#allocation10 + $0x150] sm:$0xf0] }
 0x1cc   :  { %v390_v42 = vmax.f32 %v384_v38, %v388_v41  ;;  %v4503_v38 = vld [vmem:[#allocation10 + $0x1e4] sm:$0xf]  ;;  %v3514_v41 = vor.u32 %v4505_v37, %v3513_v35  ;;  %1192 = vmatpush.bf16.msra.mxu1 %v3374_v40  ;;  %v3310_v35 = vor.u32 %v4451_v23, %v3307_v24  ;;  %v4449_v37 = vld [vmem:[#allocation10 + $0x2c] sm:$0xf0]  ;;  %v3434_v40 = vor.u32 %v4485_v31, %v3433_v28  ;;  %v3361_v23 = vld [vmem:[#allocation10 + $0xa8] sm:$0xf] }
 0x1cd   :  { %v4502_v31 = vld [vmem:[#allocation10 + $0x1d4] sm:$0xf0] }
 0x1ce   :  { %v393_v43 = vpack.c.bf16 %v390_v42, %v390_v42  ;;  %v3518_v42 = vor.u32 %v4503_v38, %v3515_v39  ;;  %v4447_v38 = vld [vmem:[#allocation10 + $0x24] sm:$0xf]  ;;  %v3291_v39 = vld [vmem:[#allocation10 + $0x30] sm:$0xf0] }
 0x1cf   :  { %v385_v44 = vpop.f32.mrf.mxu2  ;;  %1166 = vmatpush.bf16.msra.mxu3 %v3370_v36  ;;  %v3289_v36 = vld [vmem:[#allocation10 + $0x20] sm:$0xf] }
 0x1d0   :  { %546 = vmatmul.bf16.vlgmr.msra.gmra.mxu0 %v393_v43  ;;  %v3353_v43 = vld [vmem:[#allocation10 + $0xa0] sm:$0xf]  ;;  %v4465_v44 = vld [vmem:[#allocation10 + $0xac] sm:$0xf0]  ;;  %1204 = vmatpush.bf16.msra.mxu2 %v3518_v42 }
 0x1d1   :  { %1178 = vmatpush.bf16.msra.mxu0 %v3514_v41  ;;  %v3354_v52 = vor.u32 %v4465_v44, %v3353_v43  ;;  %1193 = vmatpush.bf16.msra.mxu1 %v3358_v56  ;;  %v3438_v41 = vor.u32 %v4483_v32, %v3435_v33  ;;  %v3417_v42 = vld [vmem:[#allocation10 + $0x120] sm:$0xf]  ;;  %v3290_v44 = vor.u32 %v4449_v37, %v3289_v36  ;;  %v4474_v56 = vld [vmem:[#allocation10 + $0xf4] sm:$0xf0]  ;;  %v4500_v32 = vld [vmem:[#allocation10 + $0x1cc] sm:$0xf] }
 0x1d2   :  { %v3418_v57 = vor.u32 %v4481_v45, %v3417_v42  ;;  %v3345_v36 = vld [vmem:[#allocation10 + $0x88] sm:$0xf]  ;;  %v4462_v37 = vld [vmem:[#allocation10 + $0x94] sm:$0xf0]  ;;  %v4496_v45 = vld [vmem:[#allocation10 + $0x1ac] sm:$0xf] }
 0x1d3   :  { %1167 = vmatpush.bf16.msra.mxu3 %v3354_v52  ;;  %v4443_v52 = vld [vmem:[#allocation10 + $0x4] sm:$0xf]  ;;  %v3489_v42 = vld [vmem:[#allocation10 + $0x1a8] sm:$0xf]  ;;  %v3494_v47 = vor.u32 %v4496_v45, %v3491_v46 }
 0x1d4   :  { %1205 = vmatpush.bf16.msra.mxu2 %v3502_v53  ;;  %v3275_v53 = vld [vmem:[#allocation10 + $0x10] sm:$0xf0] }
 0x1d5   :  { %1179 = vmatpush.bf16.msra.mxu0 %v3498_v49  ;;  %v3294_v49 = vor.u32 %v4447_v38, %v3291_v39  ;;  %v4460_v38 = vld [vmem:[#allocation10 + $0x8c] sm:$0xf]  ;;  %v3346_v39 = vor.u32 %v4462_v37, %v3345_v36  ;;  %v757_v37 = vld [vmem:[%s5341_s13 + $0x5] sm:$0x3] }
 0x1d6   :  { %v4476_v36 = vld [vmem:[#allocation10 + $0x10c] sm:$0xf]  ;;  %v760_v45 = vperm.slane %v757_v37, 1 }
 0x1d7   :  { %v5242_v2 = vpop.f32.mrf.mxu2 }
 0x1d9   :  { %1180 = vmatpush.bf16.msra.mxu0 %v3482_v63  ;;  %v3278_v63 = vor.u32 %v4443_v52, %v3275_v53  ;;  %v3331_v52 = vld [vmem:[#allocation10 + $0x78] sm:$0xf0] }
 0x1da   :  { %3236 = vmatmul.msk.bf16.vlgmr.msrb.gmra.mxu3 %vm653_vm5, %v647_v1  ;;  %v3486_v1 = vor.u32 %v4495_v59, %v3483_v62  ;;  %v3274_v59 = vor.u32 %v4445_v51, %v3273_v50  ;;  %v4456_v50 = vld [vmem:[#allocation10 + $0x6c] sm:$0xf] }
 0x1db   :  { %v3334_v53 = vor.u32 %v4456_v50, %v3331_v52  ;;  %v3897_v52 = vld [vmem:[#allocation11 + $0x2e0] sm:$0xf] }
 0x1dc   :  { %1206 = vmatpush.bf16.msra.mxu2 %v3486_v1 }
 0x1df   :  { %v673_v27 = vpop.f32.mrf.mxu2 }
 0x1e0   :  { %v3363_v27 = vld [vmem:[#allocation10 + $0xb8] sm:$0xf0] }
 0x24d   :  { %v534_v4 = vpop.f32.mrf.mxu3  ;;  %v547_v5 = vpop.f32.mrf.mxu0 }
 0x24e   :  { %v535_v6 = vadd.f32 %v4740_v3, %v534_v4  ;;  %v3338_v4 = vor.u32 %v4461_v55, %v3337_v54  ;;  %v3393_v55 = vld [vmem:[#allocation10 + $0xe8] sm:$0xf] }
 0x24f   :  { %v3394_v1 = vor.u32 %v4474_v56, %v3393_v55  ;;  %v4494_v55 = vld [vmem:[#allocation10 + $0x194] sm:$0xf0]  ;;  %v4492_v56 = vld [vmem:[#allocation10 + $0x18c] sm:$0xf] }
 0x250   :  { %v548_v7 = vadd.f32 %v547_v5, %v535_v6  ;;  %v4493_v5 = vld [vmem:[#allocation10 + $0x18c] sm:$0xf0]  ;;  %v4491_v6 = vld [vmem:[#allocation10 + $0x184] sm:$0xf]  ;;  %1168 = vmatpush.bf16.msra.mxu3 %v3338_v4 }
 0x251   :  { %v3466_v13 = vor.u32 %v4493_v5, %v3465_v0 }
 0x252   :  { %v551_v8 = vmul.f32 0.2, %v548_v7 }
 0x253   :  { %1181 = vmatpush.bf16.msra.mxu0 %v3466_v13 }
 0x254   :  { %v552_v9 = vmax.f32 %v548_v7, %v551_v8  ;;  %v3467_v7 = vld [vmem:[#allocation10 + $0x190] sm:$0xf0]  ;;  %v3342_v8 = vor.u32 %v4459_v60, %v3339_v61  ;;  %v4472_v60 = vld [vmem:[#allocation10 + $0xec] sm:$0xf]  ;;  %v3395_v61 = vld [vmem:[#allocation10 + $0xf8] sm:$0xf0] }
 0x255   :  { %v536_v10 = vpop.f32.mrf.mxu3  ;;  %v549_v11 = vpop.f32.mrf.mxu0  ;;  %v3470_v14 = vor.u32 %v4491_v6, %v3467_v7  ;;  %v3398_v4 = vor.u32 %v4472_v60, %v3395_v61  ;;  %v3377_v6 = vld [vmem:[#allocation10 + $0xc8] sm:$0xf]  ;;  %v4470_v7 = vld [vmem:[#allocation10 + $0xd4] sm:$0xf0] }
 0x256   :  { %v554_v12 = vpack.c.bf16 %v552_v9, %v552_v9  ;;  %v3321_v9 = vld [vmem:[#allocation10 + $0x60] sm:$0xf]  ;;  %v4457_v10 = vld [vmem:[#allocation10 + $0x6c] sm:$0xf0]  ;;  %v4455_v11 = vld [vmem:[#allocation10 + $0x64] sm:$0xf]  ;;  %1194 = vmatpush.bf16.msra.mxu1 %v3342_v8 }
 0x257   :  { %v3322_v16 = vor.u32 %v4457_v10, %v3321_v9  ;;  %1207 = vmatpush.bf16.msra.mxu2 %v3470_v14  ;;  %1182 = vmatpush.bf16.msra.mxu0 %v3450_v25  ;;  %v4468_v8 = vld [vmem:[#allocation10 + $0xcc] sm:$0xf]  ;;  %v3378_v9 = vor.u32 %v4470_v7, %v3377_v6  ;;  %v3379_v10 = vld [vmem:[#allocation10 + $0xd8] sm:$0xf0]  ;;  %v4466_v25 = vld [vmem:[#allocation10 + $0xb4] sm:$0xf0] }
 0x258   :  { %630 = vmatmul.bf16.vlgmr.msrb.gmra.mxu1 %v554_v12  ;;  %v3323_v12 = vld [vmem:[#allocation10 + $0x70] sm:$0xf0]  ;;  %v3382_v13 = vor.u32 %v4468_v8, %v3379_v10  ;;  %v3362_v28 = vor.u32 %v4466_v25, %v3361_v23  ;;  %v3313_v60 = vld [vmem:[#allocation10 + $0x48] sm:$0xf]  ;;  %v4454_v61 = vld [vmem:[#allocation10 + $0x54] sm:$0xf0] }
 0x259   :  { %v3326_v20 = vor.u32 %v4455_v11, %v3323_v12  ;;  %1169 = vmatpush.bf16.msra.mxu3 %v3322_v16  ;;  %v3401_v11 = vld [vmem:[#allocation10 + $0x100] sm:$0xf]  ;;  %v4477_v12 = vld [vmem:[#allocation10 + $0x10c] sm:$0xf0]  ;;  %v3403_v16 = vld [vmem:[#allocation10 + $0x110] sm:$0xf0] }
 0x25a   :  { %v3402_v14 = vor.u32 %v4477_v12, %v3401_v11  ;;  %v3406_v18 = vor.u32 %v4475_v15, %v3403_v16  ;;  %v4488_v6 = vld [vmem:[#allocation10 + $0x16c] sm:$0xf]  ;;  %v3459_v8 = vld [vmem:[#allocation10 + $0x178] sm:$0xf0]  ;;  %v3297_v10 = vld [vmem:[#allocation10 + $0x28] sm:$0xf] }
 0x25b   :  { %1195 = vmatpush.bf16.msra.mxu1 %v3326_v20  ;;  %1208 = vmatpush.bf16.msra.mxu2 %v3454_v26  ;;  %v4504_v20 = vld [vmem:[#allocation10 + $0x1ec] sm:$0xf]  ;;  %v4450_v11 = vld [vmem:[#allocation10 + $0x34] sm:$0xf0]  ;;  %v3441_v15 = vld [vmem:[#allocation10 + $0x148] sm:$0xf] }
 0x25c   :  { %1183 = vmatpush.bf16.msra.mxu0 %v3434_v40  ;;  %v3526_v24 = vor.u32 %v4504_v20, %v3523_v22  ;;  %v4464_v26 = vld [vmem:[#allocation10 + $0xac] sm:$0xf]  ;;  %v3347_v40 = vld [vmem:[#allocation10 + $0x98] sm:$0xf0]  ;;  %v4486_v16 = vld [vmem:[#allocation10 + $0x154] sm:$0xf0] }
 0x25d   :  { %v5244_v3 = vpop.f32.mrf.mxu3  ;;  %1170 = vmatpush.bf16.msra.mxu3 %v3306_v30  ;;  %v3505_v30 = vld [vmem:[#allocation10 + $0x1c8] sm:$0xf]  ;;  %v4448_v12 = vld [vmem:[#allocation10 + $0x2c] sm:$0xf]  ;;  %v3443_v20 = vld [vmem:[#allocation10 + $0x158] sm:$0xf0] }
 0x25e   :  { %v3506_v33 = vor.u32 %v4502_v31, %v3505_v30  ;;  %v3446_v22 = vor.u32 %v4484_v19, %v3443_v20  ;;  %v4446_v23 = vld [vmem:[#allocation10 + $0x14] sm:$0xf0]  ;;  %v3283_v25 = vld [vmem:[#allocation10 + $0x18] sm:$0xf0]  ;;  %v4480_v30 = vld [vmem:[#allocation10 + $0x12c] sm:$0xf] }
 0x25f   :  { %1196 = vmatpush.bf16.msra.mxu1 %v3310_v35  ;;  %1209 = vmatpush.bf16.msra.mxu2 %v3438_v41  ;;  %v3350_v41 = vor.u32 %v4460_v38, %v3347_v40  ;;  %v3427_v31 = vld [vmem:[#allocation10 + $0x138] sm:$0xf0]  ;;  %v3593_v20 = vld [vmem:[#allocation11 + $0x80] sm:$0xf] }
 0x260   :  { %1184 = vmatpush.bf16.msra.mxu0 %v3418_v57 }
 0x261   :  { %1171 = vmatpush.bf16.msra.mxu3 %v3290_v44 }
 0x263   :  { %1197 = vmatpush.bf16.msra.mxu1 %v3294_v49  ;;  %1210 = vmatpush.bf16.msra.mxu2 %v3422_v58  ;;  %v4458_v49 = vld [vmem:[#allocation10 + $0x74] sm:$0xf0]  ;;  %v3475_v58 = vld [vmem:[#allocation10 + $0x198] sm:$0xf0] }
 0x264   :  { %1185 = vmatpush.bf16.msra.mxu0 %v3402_v14  ;;  %v3299_v14 = vld [vmem:[#allocation10 + $0x38] sm:$0xf0] }
 0x265   :  { %v686_v29 = vpop.f32.mrf.mxu3  ;;  %1172 = vmatpush.bf16.msra.mxu3 %v3274_v59  ;;  %v3478_v59 = vor.u32 %v4492_v56, %v3475_v58  ;;  %v3302_v17 = vor.u32 %v4448_v12, %v3299_v14  ;;  %v3625_v56 = vld [vmem:[#allocation11 + $0xc0] sm:$0xf] }
 0x266   :  { %v3366_v29 = vor.u32 %v4464_v26, %v3363_v27 }
 0x267   :  { %1198 = vmatpush.bf16.msra.mxu1 %v3278_v63  ;;  %1211 = vmatpush.bf16.msra.mxu2 %v3406_v18  ;;  %v3314_v63 = vor.u32 %v4454_v61, %v3313_v60  ;;  %v3442_v18 = vor.u32 %v4486_v16, %v3441_v15  ;;  %v4533_v60 = vld [vmem:[#allocation11 + $0xcc] sm:$0xf0] }
 0x268   :  { %v4597_v61 = vld [vmem:[#allocation11 + $0x2cc] sm:$0xf0] }
 0x269   :  { %1217 = vmatpush.bf16.msrb.mxu3 %v3394_v1  ;;  %v3315_v1 = vld [vmem:[#allocation10 + $0x58] sm:$0xf0]  ;;  %v4565_v16 = vld [vmem:[#allocation11 + $0x1cc] sm:$0xf0] }
 0x26b   :  { %1243 = vmatpush.bf16.msrb.mxu1 %v3398_v4  ;;  %v3457_v4 = vld [vmem:[#allocation10 + $0x168] sm:$0xf] }
 0x26d   :  { %1218 = vmatpush.bf16.msrb.mxu3 %v3378_v9  ;;  %v3462_v9 = vor.u32 %v4488_v6, %v3459_v8  ;;  %v4529_v8 = vld [vmem:[#allocation11 + $0xac] sm:$0xf0] }
 0x26f   :  { %1244 = vmatpush.bf16.msrb.mxu1 %v3382_v13  ;;  %v3298_v13 = vor.u32 %v4450_v11, %v3297_v10  ;;  %v4593_v10 = vld [vmem:[#allocation11 + $0x2ac] sm:$0xf0] }
 0x271   :  { %1219 = vmatpush.bf16.msrb.mxu3 %v3362_v28  ;;  %v3425_v28 = vld [vmem:[#allocation10 + $0x128] sm:$0xf] }
 0x273   :  { %1245 = vmatpush.bf16.msrb.mxu1 %v3366_v29  ;;  %v4482_v29 = vld [vmem:[#allocation10 + $0x134] sm:$0xf0] }
 0x275   :  { %1220 = vmatpush.bf16.msrb.mxu3 %v3346_v39  ;;  %v3411_v39 = vld [vmem:[#allocation10 + $0x118] sm:$0xf0] }
 0x276   :  { %v3414_v40 = vor.u32 %v4476_v36, %v3411_v39  ;;  %v4585_v36 = vld [vmem:[#allocation11 + $0x26c] sm:$0xf0] }
 0x277   :  { %1246 = vmatpush.bf16.msrb.mxu1 %v3350_v41  ;;  %v759_v41 = vperm.slane %v757_v37, 0 }
 0x27b   :  { %1247 = vmatpush.bf16.msrb.mxu1 %v3334_v53  ;;  %v4601_v53 = vld [vmem:[#allocation11 + $0x2ec] sm:$0xf0] }
 0x2d5   :  { %v631_v43 = vpop.f32.mrf.mxu1 }
 0x2d6   :  { %v632_v48 = vadd.f32 %v4741_v34, %v631_v43  ;;  %v3507_v34 = vld [vmem:[#allocation10 + $0x1d8] sm:$0xf0]  ;;  %v4498_v43 = vld [vmem:[#allocation10 + $0x1b4] sm:$0xf0] }
 0x2d7   :  { %v3510_v35 = vor.u32 %v4500_v32, %v3507_v34  ;;  %v3490_v44 = vor.u32 %v4498_v43, %v3489_v42  ;;  %v3426_v32 = vor.u32 %v4482_v29, %v3425_v28  ;;  %v3409_v34 = vld [vmem:[#allocation10 + $0x108] sm:$0xf]  ;;  %v4561_v28 = vld [vmem:[#allocation11 + $0x1ac] sm:$0xf0]  ;;  %v3993_v29 = vld [vmem:[#allocation11 + $0x3a0] sm:$0xf] }
 0x2d8   :  { %v635_v54 = vmul.f32 0.2, %v632_v48 }
 0x2da   :  { %v636_v62 = vmax.f32 %v632_v48, %v635_v54  ;;  %v3329_v48 = vld [vmem:[#allocation10 + $0x68] sm:$0xf] }
 0x2db   :  { %v3330_v51 = vor.u32 %v4458_v49, %v3329_v48  ;;  %v3473_v54 = vld [vmem:[#allocation10 + $0x188] sm:$0xf]  ;;  %v4537_v48 = vld [vmem:[#allocation11 + $0xec] sm:$0xf0] }
 0x2dc   :  { %v638_v0 = vpack.c.bf16 %v636_v62, %v636_v62  ;;  %v3474_v57 = vor.u32 %v4494_v55, %v3473_v54  ;;  %v4452_v62 = vld [vmem:[#allocation10 + $0x4c] sm:$0xf] }
 0x2dd   :  { %v633_v5 = vpop.f32.mrf.mxu1  ;;  %1221 = vmatpush.bf16.msrb.mxu3 %v3330_v51 }
 0x2de   :  { %3269 = vmatmul.msk.bf16.vlgmr.msrb.gmra.mxu0 %vm187_vm0, %v638_v0  ;;  %3270 = vmatmul.msk.bf16.vlgmr.msrb.gmra.mxu2 %vm187_vm0, %v638_v0  ;;  %v3318_v0 = vor.u32 %v4452_v62, %v3315_v1  ;;  %v4490_v5 = vld [vmem:[#allocation10 + $0x174] sm:$0xf0]  ;;  %v3769_v62 = vld [vmem:[#allocation11 + $0x1e0] sm:$0xf] }
 0x2df   :  { %1230 = vmatpush.bf16.msrb.mxu0 %v3522_v21  ;;  %1256 = vmatpush.bf16.msrb.mxu2 %v3526_v24  ;;  %v3458_v7 = vor.u32 %v4490_v5, %v3457_v4  ;;  %v3281_v21 = vld [vmem:[#allocation10 + $0x8] sm:$0xf]  ;;  %v4444_v24 = vld [vmem:[#allocation10 + $0xc] sm:$0xf]  ;;  %v3626_v4 = vor.u32 %v4533_v60, %v3625_v56  ;;  %v3609_v5 = vld [vmem:[#allocation11 + $0xa0] sm:$0xf] }
 0x2e0   :  { %1248 = vmatpush.bf16.msrb.mxu1 %v3318_v0  ;;  %v3282_v26 = vor.u32 %v4446_v23, %v3281_v21  ;;  %v3286_v27 = vor.u32 %v4444_v24, %v3283_v25  ;;  %v4633_v0 = vld [vmem:[#allocation11 + $0x3ec] sm:$0xf0]  ;;  %v3610_v19 = vor.u32 %v4529_v8, %v3609_v5  ;;  %v3849_v23 = vld [vmem:[#allocation11 + $0x280] sm:$0xf]  ;;  %v4535_v8 = vld [vmem:[#allocation11 + $0xe4] sm:$0xf] }
 0x2e1   :  { %1222 = vmatpush.bf16.msrb.mxu3 %v3314_v63  ;;  %v4569_v63 = vld [vmem:[#allocation11 + $0x1ec] sm:$0xf0]  ;;  %v3545_v56 = vld [vmem:[#allocation11 + $0x20] sm:$0xf] }
 0x2e2   :  { %v3770_v12 = vor.u32 %v4569_v63, %v3769_v62  ;;  %v4589_v24 = vld [vmem:[#allocation11 + $0x28c] sm:$0xf0]  ;;  %v3801_v60 = vld [vmem:[#allocation11 + $0x220] sm:$0xf] }
 0x2e3   :  { %1231 = vmatpush.bf16.msrb.mxu0 %v3506_v33  ;;  %1257 = vmatpush.bf16.msrb.mxu2 %v3510_v35  ;;  %v3430_v33 = vor.u32 %v4480_v30, %v3427_v31  ;;  %v4478_v35 = vld [vmem:[#allocation10 + $0x114] sm:$0xf0]  ;;  %v4625_v30 = vld [vmem:[#allocation11 + $0x3ac] sm:$0xf0]  ;;  %v3689_v62 = vld [vmem:[#allocation11 + $0x140] sm:$0xf] }
 0x2e4   :  { %1249 = vmatpush.bf16.msrb.mxu1 %v3302_v17  ;;  %v3410_v38 = vor.u32 %v4478_v35, %v3409_v34  ;;  %v4009_v17 = vld [vmem:[#allocation11 + $0x3c0] sm:$0xf]  ;;  %v4521_v34 = vld [vmem:[#allocation11 + $0x6c] sm:$0xf0]  ;;  %v3994_v39 = vor.u32 %v4625_v30, %v3993_v29 }
 0x2e5   :  { %1223 = vmatpush.bf16.msrb.mxu3 %v3298_v13  ;;  %v3753_v13 = vld [vmem:[#allocation11 + $0x1c0] sm:$0xf] }
 0x2e6   :  { %v3754_v25 = vor.u32 %v4565_v16, %v3753_v13  ;;  %v3833_v35 = vld [vmem:[#allocation11 + $0x260] sm:$0xf] }
 0x2e7   :  { %1232 = vmatpush.bf16.msrb.mxu0 %v3490_v44  ;;  %1258 = vmatpush.bf16.msrb.mxu2 %v3494_v47  ;;  %v3641_v47 = vld [vmem:[#allocation11 + $0xe0] sm:$0xf] }
 0x2e8   :  { %1250 = vmatpush.bf16.msrb.mxu1 %v3286_v27  ;;  %v3642_v55 = vor.u32 %v4537_v48, %v3641_v47  ;;  %v3817_v47 = vld [vmem:[#allocation11 + $0x240] sm:$0xf]  ;;  %v4581_v48 = vld [vmem:[#allocation11 + $0x24c] sm:$0xf0] }
 0x2e9   :  { %1224 = vmatpush.bf16.msrb.mxu3 %v3282_v26  ;;  %v3737_v26 = vld [vmem:[#allocation11 + $0x1a0] sm:$0xf] }
 0x2ea   :  { %v3738_v37 = vor.u32 %v4561_v28, %v3737_v26  ;;  %v3529_v5 = vld [vmem:[#allocation11] sm:$0xf]  ;;  %v3755_v28 = vld [vmem:[#allocation11 + $0x1d0] sm:$0xf0] }
 0x2eb   :  { %1233 = vmatpush.bf16.msrb.mxu0 %v3474_v57  ;;  %1259 = vmatpush.bf16.msrb.mxu2 %v3478_v59  ;;  %v3898_v57 = vor.u32 %v4601_v53, %v3897_v52  ;;  %v4553_v52 = vld [vmem:[#allocation11 + $0x16c] sm:$0xf0]  ;;  %v3961_v53 = vld [vmem:[#allocation11 + $0x360] sm:$0xf] }
 0x2ef   :  { %1234 = vmatpush.bf16.msrb.mxu0 %v3458_v7  ;;  %1260 = vmatpush.bf16.msrb.mxu2 %v3462_v9  ;;  %v3865_v9 = vld [vmem:[#allocation11 + $0x2a0] sm:$0xf] }
 0x2f0   :  { %v3866_v21 = vor.u32 %v4593_v10, %v3865_v9  ;;  %v3643_v9 = vld [vmem:[#allocation11 + $0xf0] sm:$0xf0] }
 0x2f3   :  { %1235 = vmatpush.bf16.msrb.mxu0 %v3442_v18  ;;  %1261 = vmatpush.bf16.msrb.mxu2 %v3446_v22  ;;  %v4629_v18 = vld [vmem:[#allocation11 + $0x3cc] sm:$0xf0] }
 0x2f4   :  { %v4525_v22 = vld [vmem:[#allocation11 + $0x8c] sm:$0xf0]  ;;  %v4010_v27 = vor.u32 %v4629_v18, %v4009_v17  ;;  %v4531_v17 = vld [vmem:[#allocation11 + $0xc4] sm:$0xf]  ;;  %v3627_v18 = vld [vmem:[#allocation11 + $0xd0] sm:$0xf0] }
 0x2f5   :  { %v3594_v31 = vor.u32 %v4525_v22, %v3593_v20  ;;  %v4567_v20 = vld [vmem:[#allocation11 + $0x1e4] sm:$0xf]  ;;  %v3630_v22 = vor.u32 %v4531_v17, %v3627_v18  ;;  %v3531_v17 = vld [vmem:[#allocation11 + $0x10] sm:$0xf0] }
 0x2f6   :  { %v4543_v18 = vld [vmem:[#allocation11 + $0x124] sm:$0xf] }
 0x2f7   :  { %1236 = vmatpush.bf16.msrb.mxu0 %v3426_v32  ;;  %1262 = vmatpush.bf16.msrb.mxu2 %v3430_v33  ;;  %v3577_v32 = vld [vmem:[#allocation11 + $0x60] sm:$0xf]  ;;  %v3850_v33 = vor.u32 %v4589_v24, %v3849_v23  ;;  %v4527_v24 = vld [vmem:[#allocation11 + $0xa4] sm:$0xf] }
 0x2fb   :  { %1237 = vmatpush.bf16.msrb.mxu0 %v3410_v38  ;;  %1263 = vmatpush.bf16.msrb.mxu2 %v3414_v40  ;;  %v3721_v38 = vld [vmem:[#allocation11 + $0x180] sm:$0xf]  ;;  %v4557_v40 = vld [vmem:[#allocation11 + $0x18c] sm:$0xf0] }
 0x35b   :  { %v740_v42 = vpop.f32.mrf.mxu0 }
 0x35c   :  { %v741_v43 = vadd.f32 %v740_v42, %v5242_v2  ;;  %v3881_v2 = vld [vmem:[#allocation11 + $0x2c0] sm:$0xf]  ;;  %v4621_v42 = vld [vmem:[#allocation11 + $0x38c] sm:$0xf0] }
 0x35d   :  { %v3882_v6 = vor.u32 %v4597_v61, %v3881_v2  ;;  %v4577_v2 = vld [vmem:[#allocation11 + $0x22c] sm:$0xf0] }
 0x35e   :  { %v763_v44 = vadd.f32 %v759_v41, %v741_v43  ;;  %v3977_v41 = vld [vmem:[#allocation11 + $0x380] sm:$0xf]  ;;  %v3578_v43 = vor.u32 %v4521_v34, %v3577_v32  ;;  %v3595_v32 = vld [vmem:[#allocation11 + $0x90] sm:$0xf0] }
 0x360   :  { %v765_v46 = vmul.f32 0.2, %v763_v44 }
 0x361   :  { %v753_v49 = vpop.f32.mrf.mxu2 }
 0x362   :  { %v767_v50 = vmax.f32 %v763_v44, %v765_v46  ;;  %v754_v51 = vadd.f32 %v753_v49, %v5244_v3  ;;  %v4025_v3 = vld [vmem:[#allocation11 + $0x3e0] sm:$0xf]  ;;  %v4517_v46 = vld [vmem:[#allocation11 + $0x4c] sm:$0xf0]  ;;  %v3722_v49 = vor.u32 %v4557_v40, %v3721_v38 }
 0x363   :  { %v742_v54 = vpop.f32.mrf.mxu0  ;;  %v4026_v14 = vor.u32 %v4633_v0, %v4025_v3  ;;  %v3561_v44 = vld [vmem:[#allocation11 + $0x40] sm:$0xf]  ;;  %v4613_v0 = vld [vmem:[#allocation11 + $0x34c] sm:$0xf0] }
 0x364   :  { %v5256_v58 = vpack.c.bf16 %v767_v50, %v767_v50  ;;  %v764_v59 = vadd.f32 %v760_v45, %v754_v51  ;;  %v3834_v45 = vor.u32 %v4585_v36, %v3833_v35  ;;  %v3705_v50 = vld [vmem:[#allocation11 + $0x160] sm:$0xf]  ;;  %v3978_v51 = vor.u32 %v4621_v42, %v3977_v41  ;;  %v4617_v54 = vld [vmem:[#allocation11 + $0x36c] sm:$0xf0]  ;;  %v3739_v35 = vld [vmem:[#allocation11 + $0x1b0] sm:$0xf0] }
 0x365   :  { %v3706_v61 = vor.u32 %v4553_v52, %v3705_v50  ;;  %v3962_v63 = vor.u32 %v4617_v54, %v3961_v53  ;;  %v3945_v3 = vld [vmem:[#allocation11 + $0x340] sm:$0xf]  ;;  %v4573_v38 = vld [vmem:[#allocation11 + $0x20c] sm:$0xf0]  ;;  %v4519_v42 = vld [vmem:[#allocation11 + $0x64] sm:$0xf] }
 0x366   :  { %v766_v1 = vmul.f32 0.2, %v764_v59  ;;  %1173 = vmatmul.bf16.vlgmr.msra.gmra.mxu3 %v5256_v58  ;;  %1199 = vmatmul.bf16.vlgmr.msra.gmra.mxu1 %v5256_v58  ;;  %v3946_v10 = vor.u32 %v4613_v0, %v3945_v3  ;;  %v4609_v41 = vld [vmem:[#allocation11 + $0x32c] sm:$0xf0]  ;;  %v3899_v50 = vld [vmem:[#allocation11 + $0x2f0] sm:$0xf0] }
 0x367   :  { %2059 = vmatpush.bf16.msra.mxu3 %v3642_v55  ;;  %2085 = vmatpush.bf16.msra.mxu1 %v3898_v57  ;;  %v3562_v55 = vor.u32 %v4517_v46, %v3561_v44  ;;  %v3818_v57 = vor.u32 %v4581_v48, %v3817_v47  ;;  %v4555_v46 = vld [vmem:[#allocation11 + $0x184] sm:$0xf]  ;;  %v3723_v47 = vld [vmem:[#allocation11 + $0x190] sm:$0xf0]  ;;  %v3913_v52 = vld [vmem:[#allocation11 + $0x300] sm:$0xf] }
 0x368   :  { %v768_v7 = vmax.f32 %v764_v59, %v766_v1  ;;  %v4513_v59 = vld [vmem:[#allocation11 + $0x2c] sm:$0xf0]  ;;  %v4599_v48 = vld [vmem:[#allocation11 + $0x2e4] sm:$0xf]  ;;  %v4027_v3 = vld [vmem:[#allocation11 + $0x3f0] sm:$0xf0] }
 0x369   :  { %v755_v11 = vpop.f32.mrf.mxu2  ;;  %v4549_v1 = vld [vmem:[#allocation11 + $0x14c] sm:$0xf0] }
 0x36a   :  { %v5260_v15 = vpack.c.bf16 %v768_v7, %v768_v7  ;;  %v3690_v7 = vor.u32 %v4549_v1, %v3689_v62  ;;  %v3673_v11 = vld [vmem:[#allocation11 + $0x120] sm:$0xf]  ;;  %v4605_v53 = vld [vmem:[#allocation11 + $0x30c] sm:$0xf0]  ;;  %v4631_v1 = vld [vmem:[#allocation11 + $0x3e4] sm:$0xf] }
 0x36b   :  { %2060 = vmatpush.bf16.msra.mxu3 %v3626_v4  ;;  %2086 = vmatpush.bf16.msra.mxu1 %v3882_v6  ;;  %v3802_v4 = vor.u32 %v4577_v2, %v3801_v60  ;;  %v4509_v6 = vld [vmem:[#allocation11 + $0xc] sm:$0xf0]  ;;  %v3914_v54 = vor.u32 %v4605_v53, %v3913_v52  ;;  %v3707_v60 = vld [vmem:[#allocation11 + $0x170] sm:$0xf0]  ;;  %v4595_v2 = vld [vmem:[#allocation11 + $0x2c4] sm:$0xf]  ;;  %v4030_v0 = vor.u32 %v4631_v1, %v4027_v3 }
 0x36c   :  { %1186 = vmatmul.bf16.vlgmr.msra.gmra.mxu0 %v5260_v15  ;;  %1212 = vmatmul.bf16.vlgmr.msra.gmra.mxu2 %v5260_v15  ;;  %v3530_v13 = vor.u32 %v4509_v6, %v3529_v5  ;;  %v4547_v5 = vld [vmem:[#allocation11 + $0x144] sm:$0xf]  ;;  %v3931_v52 = vld [vmem:[#allocation11 + $0x330] sm:$0xf0] }
 0x36d   :  { %2072 = vmatpush.bf16.msra.mxu0 %v3770_v12  ;;  %2098 = vmatpush.bf16.msra.mxu2 %v4026_v14  ;;  %v4545_v12 = vld [vmem:[#allocation11 + $0x12c] sm:$0xf0]  ;;  %v3646_v14 = vor.u32 %v4535_v8, %v3643_v9  ;;  %v4591_v8 = vld [vmem:[#allocation11 + $0x2a4] sm:$0xf]  ;;  %v3867_v9 = vld [vmem:[#allocation11 + $0x2b0] sm:$0xf0] }
 0x36e   :  { %v3674_v16 = vor.u32 %v4545_v12, %v3673_v11  ;;  %v3870_v11 = vor.u32 %v4591_v8, %v3867_v9  ;;  %v4627_v12 = vld [vmem:[#allocation11 + $0x3c4] sm:$0xf] }
 0x36f   :  { %2061 = vmatpush.bf16.msra.mxu3 %v3610_v19  ;;  %2087 = vmatpush.bf16.msra.mxu1 %v3866_v21  ;;  %v4541_v19 = vld [vmem:[#allocation11 + $0x10c] sm:$0xf0]  ;;  %v3771_v21 = vld [vmem:[#allocation11 + $0x1f0] sm:$0xf0] }
 0x370   :  { %v3774_v26 = vor.u32 %v4567_v20, %v3771_v21  ;;  %v4587_v20 = vld [vmem:[#allocation11 + $0x284] sm:$0xf]  ;;  %v3851_v21 = vld [vmem:[#allocation11 + $0x290] sm:$0xf0] }
 0x371   :  { %2073 = vmatpush.bf16.msra.mxu0 %v3754_v25  ;;  %2099 = vmatpush.bf16.msra.mxu2 %v4010_v27  ;;  %v3611_v25 = vld [vmem:[#allocation11 + $0xb0] sm:$0xf0]  ;;  %v4563_v27 = vld [vmem:[#allocation11 + $0x1c4] sm:$0xf] }
 0x372   :  { %v3614_v29 = vor.u32 %v4527_v24, %v3611_v25  ;;  %v3758_v30 = vor.u32 %v4563_v27, %v3755_v28  ;;  %v4623_v24 = vld [vmem:[#allocation11 + $0x3a4] sm:$0xf]  ;;  %v3995_v25 = vld [vmem:[#allocation11 + $0x3b0] sm:$0xf0] }
 0x373   :  { %2062 = vmatpush.bf16.msra.mxu3 %v3594_v31  ;;  %2088 = vmatpush.bf16.msra.mxu1 %v3850_v33  ;;  %v4523_v31 = vld [vmem:[#allocation11 + $0x84] sm:$0xf]  ;;  %v3659_v28 = vld [vmem:[#allocation11 + $0x110] sm:$0xf0] }
 0x374   :  { %v4559_v33 = vld [vmem:[#allocation11 + $0x1a4] sm:$0xf]  ;;  %v3598_v34 = vor.u32 %v4523_v31, %v3595_v32  ;;  %v3835_v31 = vld [vmem:[#allocation11 + $0x270] sm:$0xf0] }
 0x375   :  { %2074 = vmatpush.bf16.msra.mxu0 %v3738_v37  ;;  %2100 = vmatpush.bf16.msra.mxu2 %v3994_v39  ;;  %v3742_v36 = vor.u32 %v4559_v33, %v3739_v35  ;;  %v3785_v37 = vld [vmem:[#allocation11 + $0x200] sm:$0xf]  ;;  %v4539_v27 = vld [vmem:[#allocation11 + $0x104] sm:$0xf]  ;;  %v3979_v33 = vld [vmem:[#allocation11 + $0x390] sm:$0xf0] }
 0x376   :  { %1225 = vmatmul.bf16.vlgmr.msrb.gmra.mxu3 %v5256_v58  ;;  %1251 = vmatmul.bf16.vlgmr.msrb.gmra.mxu1 %v5256_v58  ;;  %v3546_v58 = vor.u32 %v4513_v59, %v3545_v56  ;;  %v3929_v39 = vld [vmem:[#allocation11 + $0x320] sm:$0xf]  ;;  %v3786_v40 = vor.u32 %v4573_v38, %v3785_v37  ;;  %v3563_v56 = vld [vmem:[#allocation11 + $0x50] sm:$0xf0]  ;;  %v4619_v32 = vld [vmem:[#allocation11 + $0x384] sm:$0xf] }
 0x377   :  { %2063 = vmatpush.bf16.msra.mxu3 %v3578_v43  ;;  %2089 = vmatpush.bf16.msra.mxu1 %v3834_v45  ;;  %v3579_v43 = vld [vmem:[#allocation11 + $0x70] sm:$0xf0]  ;;  %v3930_v44 = vor.u32 %v4609_v41, %v3929_v39  ;;  %v3982_v35 = vor.u32 %v4619_v32, %v3979_v33  ;;  %v4615_v39 = vld [vmem:[#allocation11 + $0x364] sm:$0xf] }
 0x378   :  { %v3582_v45 = vor.u32 %v4519_v42, %v3579_v43  ;;  %v3819_v37 = vld [vmem:[#allocation11 + $0x250] sm:$0xf0]  ;;  %v4575_v42 = vld [vmem:[#allocation11 + $0x224] sm:$0xf] }
 0x379   :  { %2075 = vmatpush.bf16.msra.mxu0 %v3722_v49  ;;  %2101 = vmatpush.bf16.msra.mxu2 %v3978_v51  ;;  %v3726_v49 = vor.u32 %v4555_v46, %v3723_v47  ;;  %v3902_v51 = vor.u32 %v4599_v48, %v3899_v50  ;;  %v3803_v43 = vld [vmem:[#allocation11 + $0x230] sm:$0xf0]  ;;  %v4571_v48 = vld [vmem:[#allocation11 + $0x204] sm:$0xf] }
 0x37a   :  { %v3947_v46 = vld [vmem:[#allocation11 + $0x350] sm:$0xf0]  ;;  %v4607_v50 = vld [vmem:[#allocation11 + $0x324] sm:$0xf] }
 0x37b   :  { %2064 = vmatpush.bf16.msra.mxu3 %v3562_v55  ;;  %2090 = vmatpush.bf16.msra.mxu1 %v3818_v57  ;;  %v4515_v55 = vld [vmem:[#allocation11 + $0x44] sm:$0xf] }
 0x37c   :  { %1238 = vmatmul.bf16.vlgmr.msrb.gmra.mxu0 %v5260_v15  ;;  %1264 = vmatmul.bf16.vlgmr.msrb.gmra.mxu2 %v5260_v15  ;;  %v3657_v15 = vld [vmem:[#allocation11 + $0x100] sm:$0xf]  ;;  %v4551_v57 = vld [vmem:[#allocation11 + $0x164] sm:$0xf]  ;;  %v3566_v59 = vor.u32 %v4515_v55, %v3563_v56  ;;  %v5271_v55 = vld [vmem:[%s5341_s13 + $0x7] sm:$0xf] }
 0x37d   :  { %2076 = vmatpush.bf16.msra.mxu0 %v3706_v61  ;;  %2102 = vmatpush.bf16.msra.mxu2 %v3962_v63  ;;  %v3658_v23 = vor.u32 %v4541_v19, %v3657_v15  ;;  %v3883_v61 = vld [vmem:[#allocation11 + $0x2d0] sm:$0xf0]  ;;  %v3710_v62 = vor.u32 %v4551_v57, %v3707_v60  ;;  %v837_v56 = vperm.slane %v5271_v55, 0  ;;  %v4603_v57 = vld [vmem:[#allocation11 + $0x304] sm:$0xf] }
 0x37e   :  { %v3886_v63 = vor.u32 %v4595_v2, %v3883_v61  ;;  %v3675_v19 = vld [vmem:[#allocation11 + $0x130] sm:$0xf0] }
 0x37f   :  { %2065 = vmatpush.bf16.msra.mxu3 %v3546_v58  ;;  %2091 = vmatpush.bf16.msra.mxu1 %v3802_v4  ;;  %v4511_v58 = vld [vmem:[#allocation11 + $0x24] sm:$0xf]  ;;  %v3547_v4 = vld [vmem:[#allocation11 + $0x30] sm:$0xf0] }
 0x380   :  { %v3550_v6 = vor.u32 %v4511_v58, %v3547_v4  ;;  %v3649_v4 = vld [vmem:[#allocation11 + $0xe8] sm:$0xf] }
 0x381   :  { %2077 = vmatpush.bf16.msra.mxu0 %v3690_v7  ;;  %2103 = vmatpush.bf16.msra.mxu2 %v3946_v10  ;;  %v3691_v7 = vld [vmem:[#allocation11 + $0x150] sm:$0xf0] }
 0x382   :  { %v3694_v10 = vor.u32 %v4547_v5, %v3691_v7  ;;  %v4538_v5 = vld [vmem:[#allocation11 + $0xf4] sm:$0xf0] }
 0x383   :  { %2066 = vmatpush.bf16.msra.mxu3 %v3530_v13  ;;  %2092 = vmatpush.bf16.msra.mxu1 %v3786_v40  ;;  %v4011_v13 = vld [vmem:[#allocation11 + $0x3d0] sm:$0xf0] }
 0x384   :  { %v3963_v40 = vld [vmem:[#allocation11 + $0x370] sm:$0xf0] }
 0x385   :  { %2078 = vmatpush.bf16.msra.mxu0 %v3674_v16  ;;  %2104 = vmatpush.bf16.msra.mxu2 %v3930_v44  ;;  %v4507_v16 = vld [vmem:[#allocation11 + $0x4] sm:$0xf]  ;;  %v3966_v41 = vor.u32 %v4615_v39, %v3963_v40 }
 0x386   :  { %v3534_v15 = vor.u32 %v4507_v16, %v3531_v17  ;;  %v4611_v44 = vld [vmem:[#allocation11 + $0x344] sm:$0xf]  ;;  %v3777_v17 = vld [vmem:[#allocation11 + $0x1e8] sm:$0xf] }
 0x387   :  { %2111 = vmatpush.bf16.msrb.mxu3 %v3646_v14  ;;  %2137 = vmatpush.bf16.msrb.mxu1 %v3902_v51  ;;  %v4014_v14 = vor.u32 %v4627_v12, %v4011_v13  ;;  %v3950_v47 = vor.u32 %v4611_v44, %v3947_v46  ;;  %v3633_v12 = vld [vmem:[#allocation11 + $0xc8] sm:$0xf]  ;;  %v4534_v13 = vld [vmem:[#allocation11 + $0xd4] sm:$0xf0] }
 0x388   :  { %v4522_v44 = vld [vmem:[#allocation11 + $0x74] sm:$0xf0] }
 0x389   :  { %2079 = vmatpush.bf16.msra.mxu0 %v3658_v23  ;;  %2105 = vmatpush.bf16.msra.mxu2 %v3914_v54  ;;  %v3854_v23 = vor.u32 %v4587_v20, %v3851_v21  ;;  %v3934_v54 = vor.u32 %v4607_v50, %v3931_v52  ;;  %v3634_v20 = vor.u32 %v4534_v13, %v3633_v12  ;;  %v3905_v50 = vld [vmem:[#allocation11 + $0x2e8] sm:$0xf] }
 0x38a   :  { %v3697_v13 = vld [vmem:[#allocation11 + $0x148] sm:$0xf] }
 0x38b   :  { %2112 = vmatpush.bf16.msrb.mxu3 %v3630_v22  ;;  %2138 = vmatpush.bf16.msrb.mxu1 %v3886_v63  ;;  %v3678_v22 = vor.u32 %v4543_v18, %v3675_v19  ;;  %v4570_v18 = vld [vmem:[#allocation11 + $0x1f4] sm:$0xf0] }
 0x38c   :  { %v3778_v21 = vor.u32 %v4570_v18, %v3777_v17  ;;  %v3873_v17 = vld [vmem:[#allocation11 + $0x2a8] sm:$0xf] }
 0x38d   :  { %2124 = vmatpush.bf16.msrb.mxu0 %v3774_v26  ;;  %2150 = vmatpush.bf16.msrb.mxu2 %v4030_v0  ;;  %v3998_v26 = vor.u32 %v4623_v24, %v3995_v25  ;;  %v4530_v25 = vld [vmem:[#allocation11 + $0xb4] sm:$0xf0] }
 0x38f   :  { %2113 = vmatpush.bf16.msrb.mxu3 %v3614_v29  ;;  %2139 = vmatpush.bf16.msrb.mxu1 %v3870_v11  ;;  %v4583_v29 = vld [vmem:[#allocation11 + $0x264] sm:$0xf]  ;;  %v3650_v11 = vor.u32 %v4538_v5, %v3649_v4  ;;  %v4634_v4 = vld [vmem:[#allocation11 + $0x3f4] sm:$0xf0] }
 0x391   :  { %2125 = vmatpush.bf16.msrb.mxu0 %v3758_v30  ;;  %2151 = vmatpush.bf16.msrb.mxu2 %v4014_v14  ;;  %v3662_v30 = vor.u32 %v4539_v27, %v3659_v28  ;;  %v4566_v27 = vld [vmem:[#allocation11 + $0x1d4] sm:$0xf0] }
 0x393   :  { %2114 = vmatpush.bf16.msrb.mxu3 %v3598_v34  ;;  %2140 = vmatpush.bf16.msrb.mxu1 %v3854_v23  ;;  %v3838_v34 = vor.u32 %v4583_v29, %v3835_v31  ;;  %v3617_v23 = vld [vmem:[#allocation11 + $0xa8] sm:$0xf]  ;;  %v840_v29 = vperm.slane %v5271_v55, 3 }
 0x394   :  { %v3618_v32 = vor.u32 %v4530_v25, %v3617_v23  ;;  %v3537_v23 = vld [vmem:[#allocation11 + $0x8] sm:$0xf]  ;;  %v4510_v25 = vld [vmem:[#allocation11 + $0x14] sm:$0xf0] }
 0x395   :  { %2126 = vmatpush.bf16.msrb.mxu0 %v3742_v36  ;;  %2152 = vmatpush.bf16.msrb.mxu2 %v3998_v26  ;;  %v4579_v36 = vld [vmem:[#allocation11 + $0x244] sm:$0xf]  ;;  %v3761_v26 = vld [vmem:[#allocation11 + $0x1c8] sm:$0xf] }
 0x396   :  { %v3822_v38 = vor.u32 %v4579_v36, %v3819_v37  ;;  %v3762_v33 = vor.u32 %v4566_v27, %v3761_v26  ;;  %v4526_v36 = vld [vmem:[#allocation11 + $0x94] sm:$0xf0]  ;;  %v3745_v37 = vld [vmem:[#allocation11 + $0x1a8] sm:$0xf] }
 0x397   :  { %2115 = vmatpush.bf16.msrb.mxu3 %v3582_v45  ;;  %2141 = vmatpush.bf16.msrb.mxu1 %v3838_v34  ;;  %v3806_v45 = vor.u32 %v4575_v42, %v3803_v43  ;;  %v3601_v34 = vld [vmem:[#allocation11 + $0x88] sm:$0xf] }
 0x398   :  { %v3585_v43 = vld [vmem:[#allocation11 + $0x68] sm:$0xf] }
 0x399   :  { %2127 = vmatpush.bf16.msrb.mxu0 %v3726_v49  ;;  %2153 = vmatpush.bf16.msrb.mxu2 %v3982_v35  ;;  %v3787_v49 = vld [vmem:[#allocation11 + $0x210] sm:$0xf0] }
 0x39a   :  { %v3790_v51 = vor.u32 %v4571_v48, %v3787_v49  ;;  %v4558_v48 = vld [vmem:[#allocation11 + $0x194] sm:$0xf0] }
 0x39b   :  { %2116 = vmatpush.bf16.msrb.mxu3 %v3566_v59  ;;  %2142 = vmatpush.bf16.msrb.mxu1 %v3822_v38  ;;  %v3915_v59 = vld [vmem:[#allocation11 + $0x310] sm:$0xf0]  ;;  %v4562_v38 = vld [vmem:[#allocation11 + $0x1b4] sm:$0xf0] }
 0x39c   :  { %v3918_v60 = vor.u32 %v4603_v57, %v3915_v59  ;;  %v3746_v42 = vor.u32 %v4562_v38, %v3745_v37  ;;  %v3569_v59 = vld [vmem:[#allocation11 + $0x48] sm:$0xf] }
 0x39d   :  { %2128 = vmatpush.bf16.msrb.mxu0 %v3710_v62  ;;  %2154 = vmatpush.bf16.msrb.mxu2 %v3966_v41  ;;  %v838_v62 = vperm.slane %v5271_v55, 1  ;;  %v3602_v41 = vor.u32 %v4526_v36, %v3601_v34  ;;  %v4536_v34 = vld [vmem:[#allocation11 + $0xec] sm:$0xf]  ;;  %v3538_v36 = vor.u32 %v4510_v25, %v3537_v23  ;;  %v3665_v38 = vld [vmem:[#allocation11 + $0x108] sm:$0xf] }
 0x39e   :  { %v4520_v23 = vld [vmem:[#allocation11 + $0x6c] sm:$0xf]  ;;  %v3587_v25 = vld [vmem:[#allocation11 + $0x78] sm:$0xf0] }
 0x39f   :  { %2117 = vmatpush.bf16.msrb.mxu3 %v3550_v6  ;;  %2143 = vmatpush.bf16.msrb.mxu1 %v3806_v45 }
 0x3a1   :  { %2129 = vmatpush.bf16.msrb.mxu0 %v3694_v10  ;;  %2155 = vmatpush.bf16.msrb.mxu2 %v3950_v47  ;;  %v3729_v47 = vld [vmem:[#allocation11 + $0x188] sm:$0xf] }
 0x3a2   :  { %v3730_v57 = vor.u32 %v4558_v48, %v3729_v47  ;;  %v4532_v47 = vld [vmem:[#allocation11 + $0xcc] sm:$0xf]  ;;  %v3635_v48 = vld [vmem:[#allocation11 + $0xd8] sm:$0xf0] }
 0x3a3   :  { %2118 = vmatpush.bf16.msrb.mxu3 %v3534_v15  ;;  %2144 = vmatpush.bf16.msrb.mxu1 %v3790_v51  ;;  %v4602_v51 = vld [vmem:[#allocation11 + $0x2f4] sm:$0xf0] }
 0x3a5   :  { %2130 = vmatpush.bf16.msrb.mxu0 %v3678_v22  ;;  %2156 = vmatpush.bf16.msrb.mxu2 %v3934_v54  ;;  %v839_v22 = vperm.slane %v5271_v55, 2 }
 0x3a9   :  { %2131 = vmatpush.bf16.msrb.mxu0 %v3662_v30  ;;  %2157 = vmatpush.bf16.msrb.mxu2 %v3918_v60  ;;  %v4518_v60 = vld [vmem:[#allocation11 + $0x54] sm:$0xf0] }
 0x3e3   :  { %v1200_v53 = vpop.f32.mrf.mxu1 }
 0x3e4   :  { %v1201_v0 = vadd.f32 %v1200_v53, %v838_v62 }
 0x3e9   :  { %v1174_v2 = vpop.f32.mrf.mxu3  ;;  %v1187_v61 = vpop.f32.mrf.mxu0 }
 0x3ea   :  { %v1175_v63 = vadd.f32 %v1174_v2, %v837_v56  ;;  %v3586_v56 = vor.u32 %v4522_v44, %v3585_v43  ;;  %v3713_v2 = vld [vmem:[#allocation11 + $0x168] sm:$0xf]  ;;  %v4586_v43 = vld [vmem:[#allocation11 + $0x274] sm:$0xf0] }
 0x3eb   :  { %v1202_v1 = vpop.f32.mrf.mxu1 }
 0x3ec   :  { %v1188_v3 = vadd.f32 %v1187_v61, %v1175_v63  ;;  %v3906_v63 = vor.u32 %v4602_v51, %v3905_v50  ;;  %v4554_v1 = vld [vmem:[#allocation11 + $0x174] sm:$0xf0]  ;;  %v3779_v50 = vld [vmem:[#allocation11 + $0x1f8] sm:$0xf0] }
 0x3ee   :  { %v1269_v58 = vmul.f32 0.2, %v1188_v3 }
 0x3ef   :  { %v1213_v6 = vpop.f32.mrf.mxu2 }
 0x3f0   :  { %v1273_v7 = vmax.f32 %v1188_v3, %v1269_v58  ;;  %v1214_v8 = vadd.f32 %v1213_v6, %v1201_v0  ;;  %v3889_v3 = vld [vmem:[#allocation11 + $0x2c8] sm:$0xf]  ;;  %v4598_v0 = vld [vmem:[#allocation11 + $0x2d4] sm:$0xf0]  ;;  %v3570_v6 = vor.u32 %v4518_v60, %v3569_v59 }
 0x3f1   :  { %v1176_v9 = vpop.f32.mrf.mxu3  ;;  %v1189_v10 = vpop.f32.mrf.mxu0  ;;  %v4033_v58 = vld [vmem:[#allocation11 + $0x3e8] sm:$0xf]  ;;  %v4618_v60 = vld [vmem:[#allocation11 + $0x374] sm:$0xf0] }
 0x3f2   :  { %v5275_v14 = vpack.c.bf16 %v1273_v7, %v1273_v7  ;;  %v1270_v16 = vmul.f32 0.2, %v1214_v8  ;;  %v3714_v7 = vor.u32 %v4554_v1, %v3713_v2  ;;  %v4514_v9 = vld [vmem:[#allocation11 + $0x34] sm:$0xf0]  ;;  %v4034_v12 = vor.u32 %v4634_v4, %v4033_v58  ;;  %v3969_v59 = vld [vmem:[#allocation11 + $0x368] sm:$0xf] }
 0x3f3   :  { %v1252_v15 = vpop.f32.mrf.mxu1  ;;  %v4528_v2 = vld [vmem:[#allocation11 + $0xac] sm:$0xf]  ;;  %v3763_v1 = vld [vmem:[#allocation11 + $0x1d8] sm:$0xf0]  ;;  %v3809_v58 = vld [vmem:[#allocation11 + $0x228] sm:$0xf] }
 0x3f4   :  { %v1274_v19 = vmax.f32 %v1214_v8, %v1270_v16  ;;  %2067 = vmatmul.bf16.vlgmr.msra.gmra.mxu3 %v5275_v14  ;;  %v1253_v45 = vadd.f32 %v1252_v15, %v840_v29  ;;  %v3553_v8 = vld [vmem:[#allocation11 + $0x28] sm:$0xf]  ;;  %v4550_v16 = vld [vmem:[#allocation11 + $0x154] sm:$0xf0] }
 0x3f5   :  { %2163 = vmatpush.bf16.msra.mxu3 %v3650_v11  ;;  %v3890_v11 = vor.u32 %v4598_v0, %v3889_v3  ;;  %v4594_v15 = vld [vmem:[#allocation11 + $0x2b4] sm:$0xf0]  ;;  %v3970_v0 = vor.u32 %v4618_v60, %v3969_v59 }
 0x3f6   :  { %v5279_v24 = vpack.c.bf16 %v1274_v19, %v1274_v19  ;;  %v4017_v19 = vld [vmem:[#allocation11 + $0x3c8] sm:$0xf]  ;;  %v3874_v26 = vor.u32 %v4594_v15, %v3873_v17  ;;  %v4546_v29 = vld [vmem:[#allocation11 + $0x134] sm:$0xf0] }
 0x3f7   :  { %v1215_v28 = vpop.f32.mrf.mxu2  ;;  %v4578_v4 = vld [vmem:[#allocation11 + $0x234] sm:$0xf0] }
 0x3f8   :  { %2080 = vmatmul.bf16.vlgmr.msra.gmra.mxu0 %v5279_v24  ;;  %v3681_v28 = vld [vmem:[#allocation11 + $0x128] sm:$0xf]  ;;  %v4574_v15 = vld [vmem:[#allocation11 + $0x214] sm:$0xf0] }
 0x3f9   :  { %2164 = vmatpush.bf16.msra.mxu3 %v3634_v20  ;;  %2176 = vmatpush.bf16.msra.mxu0 %v3778_v21  ;;  %v1226_v30 = vpop.f32.mrf.mxu3  ;;  %v1239_v31 = vpop.f32.mrf.mxu0  ;;  %v4630_v20 = vld [vmem:[#allocation11 + $0x3d4] sm:$0xf0]  ;;  %v3554_v21 = vor.u32 %v4514_v9, %v3553_v8  ;;  %v3682_v37 = vor.u32 %v4546_v29, %v3681_v28  ;;  %v4524_v9 = vld [vmem:[#allocation11 + $0x8c] sm:$0xf]  ;;  %v3907_v29 = vld [vmem:[#allocation11 + $0x2f8] sm:$0xf0] }
 0x3fa   :  { %v1227_v35 = vadd.f32 %v1226_v30, %v839_v22  ;;  %v3698_v22 = vor.u32 %v4550_v16, %v3697_v13  ;;  %v4018_v27 = vor.u32 %v4630_v20, %v4017_v19  ;;  %v3857_v30 = vld [vmem:[#allocation11 + $0x288] sm:$0xf]  ;;  %v4614_v8 = vld [vmem:[#allocation11 + $0x354] sm:$0xf0]  ;;  %v3747_v13 = vld [vmem:[#allocation11 + $0x1b8] sm:$0xf0]  ;;  %v3810_v16 = vor.u32 %v4578_v4, %v3809_v58 }
 0x3fb   :  { %v1254_v39 = vpop.f32.mrf.mxu1  ;;  %v4600_v28 = vld [vmem:[#allocation11 + $0x2ec] sm:$0xf]  ;;  %v3859_v4 = vld [vmem:[#allocation11 + $0x298] sm:$0xf0] }
 0x3fc   :  { %v1240_v40 = vadd.f32 %v1239_v31, %v1227_v35  ;;  %v4590_v31 = vld [vmem:[#allocation11 + $0x294] sm:$0xf0]  ;;  %v3651_v35 = vld [vmem:[#allocation11 + $0xf8] sm:$0xf0]  ;;  %v4588_v58 = vld [vmem:[#allocation11 + $0x28c] sm:$0xf] }
 0x3fd   :  { %2165 = vmatpush.bf16.msra.mxu3 %v3618_v32  ;;  %2177 = vmatpush.bf16.msra.mxu0 %v3762_v33  ;;  %v4001_v32 = vld [vmem:[#allocation11 + $0x3a8] sm:$0xf]  ;;  %v4626_v33 = vld [vmem:[#allocation11 + $0x3b4] sm:$0xf0]  ;;  %v3858_v39 = vor.u32 %v4590_v31, %v3857_v30  ;;  %v3654_v44 = vor.u32 %v4536_v34, %v3651_v35 }
 0x3fe   :  { %v1271_v46 = vmul.f32 0.2, %v1240_v40  ;;  %v4606_v35 = vld [vmem:[#allocation11 + $0x314] sm:$0xf0] }
 0x3ff   :  { %v1265_v49 = vpop.f32.mrf.mxu2 }
 0x400   :  { %v1275_v52 = vmax.f32 %v1240_v40, %v1271_v46  ;;  %v1266_v53 = vadd.f32 %v1265_v49, %v1253_v45  ;;  %v4002_v40 = vor.u32 %v4626_v33, %v4001_v32  ;;  %v3985_v45 = vld [vmem:[#allocation11 + $0x388] sm:$0xf]  ;;  %v4622_v46 = vld [vmem:[#allocation11 + $0x394] sm:$0xf0]  ;;  %v4568_v49 = vld [vmem:[#allocation11 + $0x1ec] sm:$0xf]  ;;  %v3590_v33 = vor.u32 %v4520_v23, %v3587_v25 }
 0x401   :  { %2166 = vmatpush.bf16.msra.mxu3 %v3602_v41  ;;  %2178 = vmatpush.bf16.msra.mxu0 %v3746_v42  ;;  %v1228_v54 = vpop.f32.mrf.mxu3  ;;  %v1241_v55 = vpop.f32.mrf.mxu0  ;;  %v4542_v41 = vld [vmem:[#allocation11 + $0x114] sm:$0xf0]  ;;  %v3841_v42 = vld [vmem:[#allocation11 + $0x268] sm:$0xf] }
 0x402   :  { %v5283_v61 = vpack.c.bf16 %v1275_v52, %v1275_v52  ;;  %v1272_v62 = vmul.f32 0.2, %v1266_v53  ;;  %v3666_v51 = vor.u32 %v4542_v41, %v3665_v38  ;;  %v3842_v52 = vor.u32 %v4586_v43, %v3841_v42  ;;  %v3825_v54 = vld [vmem:[#allocation11 + $0x248] sm:$0xf]  ;;  %v4582_v55 = vld [vmem:[#allocation11 + $0x254] sm:$0xf0] }
 0x403   :  { %v3826_v3 = vor.u32 %v4582_v55, %v3825_v54  ;;  %v3921_v32 = vld [vmem:[#allocation11 + $0x308] sm:$0xf]  ;;  %v3910_v38 = vor.u32 %v4600_v28, %v3907_v29  ;;  %v4596_v41 = vld [vmem:[#allocation11 + $0x2cc] sm:$0xf]  ;;  %v3891_v42 = vld [vmem:[#allocation11 + $0x2d8] sm:$0xf0] }
 0x404   :  { %v1276_v5 = vmax.f32 %v1266_v53, %v1272_v62  ;;  %2093 = vmatmul.bf16.vlgmr.msra.gmra.mxu1 %v5283_v61  ;;  %2119 = vmatmul.bf16.vlgmr.msrb.gmra.mxu3 %v5275_v14  ;;  %v3986_v53 = vor.u32 %v4622_v46, %v3985_v45  ;;  %v3619_v62 = vld [vmem:[#allocation11 + $0xb8] sm:$0xf0]  ;;  %v4632_v43 = vld [vmem:[#allocation11 + $0x3ec] sm:$0xf]  ;;  %v3922_v45 = vor.u32 %v4606_v35, %v3921_v32  ;;  %v4648_v23 = vld [vmem:[#allocation13 + $0x64] sm:$0xf0] }
 0x405   :  { %2167 = vmatpush.bf16.msra.mxu3 %v3586_v56  ;;  %2179 = vmatpush.bf16.msra.mxu0 %v3730_v57  ;;  %v3638_v56 = vor.u32 %v4532_v47, %v3635_v48  ;;  %v3782_v57 = vor.u32 %v4568_v49, %v3779_v50  ;;  %v4512_v48 = vld [vmem:[#allocation11 + $0x2c] sm:$0xf]  ;;  %v3555_v49 = vld [vmem:[#allocation11 + $0x38] sm:$0xf0]  ;;  %v3894_v50 = vor.u32 %v4596_v41, %v3891_v42  ;;  %v4073_v42 = vld [vmem:[#allocation13 + $0x40] sm:$0xf] }
 0x406   :  { %v5287_v10 = vpack.c.bf16 %v1276_v5, %v1276_v5  ;;  %2189 = vmatpush.bf16.msra.mxu1 %v3906_v63  ;;  %v4564_v63 = vld [vmem:[#allocation11 + $0x1cc] sm:$0xf]  ;;  %v3622_v5 = vor.u32 %v4528_v2, %v3619_v62  ;;  %v3875_v55 = vld [vmem:[#allocation11 + $0x2b8] sm:$0xf0]  ;;  %v3558_v59 = vor.u32 %v4512_v48, %v3555_v49 }
 0x407   :  { %v1267_v18 = vpop.f32.mrf.mxu2  ;;  %v4592_v54 = vld [vmem:[#allocation11 + $0x2ac] sm:$0xf]  ;;  %v3539_v62 = vld [vmem:[#allocation11 + $0x18] sm:$0xf0] }
 0x408   :  { %2106 = vmatmul.bf16.vlgmr.msra.gmra.mxu2 %v5287_v10  ;;  %2132 = vmatmul.bf16.vlgmr.msrb.gmra.mxu0 %v5279_v24  ;;  %v3793_v18 = vld [vmem:[#allocation11 + $0x208] sm:$0xf]  ;;  %v4508_v2 = vld [vmem:[#allocation11 + $0xc] sm:$0xf]  ;;  %v3827_v29 = vld [vmem:[#allocation11 + $0x258] sm:$0xf0] }
 0x409   :  { %2168 = vmatpush.bf16.msra.mxu3 %v3570_v6  ;;  %2180 = vmatpush.bf16.msra.mxu0 %v3714_v7  ;;  %v3766_v6 = vor.u32 %v4564_v63, %v3763_v1  ;;  %v3953_v7 = vld [vmem:[#allocation11 + $0x348] sm:$0xf]  ;;  %v3794_v30 = vor.u32 %v4574_v15, %v3793_v18  ;;  %v3878_v63 = vor.u32 %v4592_v54, %v3875_v55  ;;  %v4584_v18 = vld [vmem:[#allocation11 + $0x26c] sm:$0xf]  ;;  %v3843_v15 = vld [vmem:[#allocation11 + $0x278] sm:$0xf0] }
 0x40a   :  { %2190 = vmatpush.bf16.msra.mxu1 %v3890_v11  ;;  %2202 = vmatpush.bf16.msra.mxu2 %v4034_v12  ;;  %v3603_v11 = vld [vmem:[#allocation11 + $0x98] sm:$0xf0]  ;;  %v4560_v12 = vld [vmem:[#allocation11 + $0x1ac] sm:$0xf]  ;;  %v3954_v17 = vor.u32 %v4614_v8, %v3953_v7  ;;  %v4097_v7 = vld [vmem:[#allocation13 + $0x70] sm:$0xf] }
 0x40b   :  { %v3606_v19 = vor.u32 %v4524_v9, %v3603_v11  ;;  %v3750_v20 = vor.u32 %v4560_v12, %v3747_v13  ;;  %v4650_v8 = vld [vmem:[#allocation13 + $0x74] sm:$0xf0]  ;;  %v3542_v9 = vor.u32 %v4508_v2, %v3539_v62  ;;  %v3862_v12 = vor.u32 %v4588_v58, %v3859_v4  ;;  %v4580_v28 = vld [vmem:[#allocation11 + $0x24c] sm:$0xf]  ;;  %v3939_v48 = vld [vmem:[#allocation11 + $0x338] sm:$0xf0] }
 0x40c   :  { %v3830_v35 = vor.u32 %v4580_v28, %v3827_v29  ;;  %v4065_v54 = vld [vmem:[#allocation13 + $0x30] sm:$0xf]  ;;  %v4642_v55 = vld [vmem:[#allocation13 + $0x34] sm:$0xf0]  ;;  %v4640_v2 = vld [vmem:[#allocation13 + $0x24] sm:$0xf0] }
 0x40d   :  { %2169 = vmatpush.bf16.msra.mxu3 %v3554_v21  ;;  %2181 = vmatpush.bf16.msra.mxu0 %v3698_v22  ;;  %v3937_v21 = vld [vmem:[#allocation11 + $0x328] sm:$0xf]  ;;  %v4610_v22 = vld [vmem:[#allocation11 + $0x334] sm:$0xf0]  ;;  %v4049_v58 = vld [vmem:[#allocation13 + $0x10] sm:$0xf] }
 0x40e   :  { %2191 = vmatpush.bf16.msra.mxu1 %v3874_v26  ;;  %2203 = vmatpush.bf16.msra.mxu2 %v4018_v27  ;;  %v4556_v26 = vld [vmem:[#allocation11 + $0x18c] sm:$0xf]  ;;  %v3731_v27 = vld [vmem:[#allocation11 + $0x198] sm:$0xf0]  ;;  %v3938_v31 = vor.u32 %v4610_v22, %v3937_v21  ;;  %v4098_v21 = vor.u32 %v4650_v8, %v4097_v7  ;;  %v4089_v22 = vld [vmem:[#allocation13 + $0x60] sm:$0xf] }
 0x40f   :  { %v3734_v34 = vor.u32 %v4556_v26, %v3731_v27  ;;  %v3846_v26 = vor.u32 %v4584_v18, %v3843_v15  ;;  %v4090_v32 = vor.u32 %v4648_v23, %v4089_v22  ;;  %v4145_v4 = vld [vmem:[#allocation13 + $0xd0] sm:$0xf]  ;;  %v4041_v7 = vld [vmem:[#allocation13] sm:$0xf]  ;;  %v4636_v8 = vld [vmem:[#allocation13 + $0x4] sm:$0xf0] }
 0x410   :  { %v4129_v15 = vld [vmem:[#allocation13 + $0xb0] sm:$0xf]  ;;  %v4682_v22 = vld [vmem:[#allocation13 + $0x174] sm:$0xf0]  ;;  %v4647_v23 = vld [vmem:[#allocation13 + $0x64] sm:$0xf] }
 0x411   :  { %2170 = vmatpush.bf16.msra.mxu3 %v3538_v36  ;;  %2182 = vmatpush.bf16.msra.mxu0 %v3682_v37  ;;  %v4516_v36 = vld [vmem:[#allocation11 + $0x4c] sm:$0xf]  ;;  %v3571_v37 = vld [vmem:[#allocation11 + $0x58] sm:$0xf0]  ;;  %v4121_v28 = vld [vmem:[#allocation13 + $0xa0] sm:$0xf] }
 0x412   :  { %2192 = vmatpush.bf16.msra.mxu1 %v3858_v39  ;;  %2204 = vmatpush.bf16.msra.mxu2 %v4002_v40  ;;  %v4552_v39 = vld [vmem:[#allocation11 + $0x16c] sm:$0xf]  ;;  %v3715_v40 = vld [vmem:[#allocation11 + $0x178] sm:$0xf0]  ;;  %v3574_v46 = vor.u32 %v4516_v36, %v3571_v37  ;;  %v4656_v29 = vld [vmem:[#allocation13 + $0xa4] sm:$0xf0] }
 0x413   :  { %v3718_v47 = vor.u32 %v4552_v39, %v3715_v40  ;;  %v4576_v37 = vld [vmem:[#allocation11 + $0x22c] sm:$0xf]  ;;  %v3955_v40 = vld [vmem:[#allocation11 + $0x358] sm:$0xf0] }
 0x414   :  { %2145 = vmatmul.bf16.vlgmr.msrb.gmra.mxu1 %v5283_v61  ;;  %2171 = vmatmul.bf16.vlgmr.msra.gmra.mxu3 %v5275_v14  ;;  %v4612_v39 = vld [vmem:[#allocation11 + $0x34c] sm:$0xf] }
 0x415   :  { %2215 = vmatpush.bf16.msrb.mxu3 %v3654_v44  ;;  %2183 = vmatpush.bf16.msra.mxu0 %v3666_v51  ;;  %v4035_v44 = vld [vmem:[#allocation11 + $0x3f8] sm:$0xf0] }
 0x416   :  { %2193 = vmatpush.bf16.msra.mxu1 %v3842_v52  ;;  %2205 = vmatpush.bf16.msra.mxu2 %v3986_v53  ;;  %v4038_v51 = vor.u32 %v4632_v43, %v4035_v44  ;;  %v4548_v52 = vld [vmem:[#allocation11 + $0x14c] sm:$0xf]  ;;  %v3699_v53 = vld [vmem:[#allocation11 + $0x158] sm:$0xf0]  ;;  %v4644_v43 = vld [vmem:[#allocation13 + $0x44] sm:$0xf0]  ;;  %v3958_v44 = vor.u32 %v4612_v39, %v3955_v40 }
 0x417   :  { %v3702_v60 = vor.u32 %v4548_v52, %v3699_v53  ;;  %v4074_v49 = vor.u32 %v4644_v43, %v4073_v42  ;;  %v4604_v52 = vld [vmem:[#allocation11 + $0x30c] sm:$0xf]  ;;  %v3923_v53 = vld [vmem:[#allocation11 + $0x318] sm:$0xf0]  ;;  %v4209_v39 = vld [vmem:[#allocation13 + $0x150] sm:$0xf] }
 0x418   :  { %2158 = vmatmul.bf16.vlgmr.msrb.gmra.mxu2 %v5287_v10  ;;  %2184 = vmatmul.bf16.vlgmr.msra.gmra.mxu0 %v5279_v24  ;;  %v4643_v42 = vld [vmem:[#allocation13 + $0x44] sm:$0xf]  ;;  %v4075_v43 = vld [vmem:[#allocation13 + $0x48] sm:$0xf0] }
 0x419   :  { %2216 = vmatpush.bf16.msrb.mxu3 %v3638_v56  ;;  %2228 = vmatpush.bf16.msrb.mxu0 %v3782_v57  ;;  %v4628_v56 = vld [vmem:[#allocation11 + $0x3cc] sm:$0xf]  ;;  %v4019_v57 = vld [vmem:[#allocation11 + $0x3d8] sm:$0xf0] }
 0x41a   :  { %2194 = vmatpush.bf16.msra.mxu1 %v3826_v3  ;;  %2206 = vmatpush.bf16.msra.mxu2 %v3970_v0  ;;  %v4022_v1 = vor.u32 %v4628_v56, %v4019_v57  ;;  %v4544_v3 = vld [vmem:[#allocation11 + $0x12c] sm:$0xf]  ;;  %v3683_v0 = vld [vmem:[#allocation11 + $0x138] sm:$0xf0]  ;;  %v4161_v56 = vld [vmem:[#allocation13 + $0xf0] sm:$0xf]  ;;  %v4066_v57 = vor.u32 %v4642_v55, %v4065_v54 }
 0x41b   :  { %v3686_v11 = vor.u32 %v4544_v3, %v3683_v0  ;;  %v4665_v54 = vld [vmem:[#allocation13 + $0xf4] sm:$0xf]  ;;  %v4163_v55 = vld [vmem:[#allocation13 + $0xf8] sm:$0xf0] }
 0x41d   :  { %2217 = vmatpush.bf16.msrb.mxu3 %v3622_v5  ;;  %2229 = vmatpush.bf16.msrb.mxu0 %v3766_v6  ;;  %v4624_v5 = vld [vmem:[#allocation11 + $0x3ac] sm:$0xf]  ;;  %v4003_v6 = vld [vmem:[#allocation11 + $0x3b8] sm:$0xf0] }
 0x41e   :  { %2195 = vmatpush.bf16.msra.mxu1 %v3810_v16  ;;  %2207 = vmatpush.bf16.msra.mxu2 %v3954_v17  ;;  %v4006_v13 = vor.u32 %v4624_v5, %v4003_v6  ;;  %v4540_v16 = vld [vmem:[#allocation11 + $0x10c] sm:$0xf]  ;;  %v3667_v17 = vld [vmem:[#allocation11 + $0x118] sm:$0xf0]  ;;  %v4662_v5 = vld [vmem:[#allocation13 + $0xd4] sm:$0xf0] }
 0x41f   :  { %v3670_v25 = vor.u32 %v4540_v16, %v3667_v17  ;;  %v4146_v6 = vor.u32 %v4662_v5, %v4145_v4  ;;  %v4649_v16 = vld [vmem:[#allocation13 + $0x74] sm:$0xf]  ;;  %v4099_v17 = vld [vmem:[#allocation13 + $0x78] sm:$0xf0]  ;;  %v4185_v4 = vld [vmem:[#allocation13 + $0x120] sm:$0xf] }
 0x420   :  { %v4102_v18 = vor.u32 %v4649_v16, %v4099_v17 }
 0x421   :  { %2218 = vmatpush.bf16.msrb.mxu3 %v3606_v19  ;;  %2230 = vmatpush.bf16.msrb.mxu0 %v3750_v20  ;;  %v4620_v19 = vld [vmem:[#allocation11 + $0x38c] sm:$0xf]  ;;  %v3987_v20 = vld [vmem:[#allocation11 + $0x398] sm:$0xf0] }
 0x422   :  { %2196 = vmatpush.bf16.msra.mxu1 %v3794_v30  ;;  %2208 = vmatpush.bf16.msra.mxu2 %v3938_v31  ;;  %v3990_v27 = vor.u32 %v4620_v19, %v3987_v20  ;;  %v4616_v30 = vld [vmem:[#allocation11 + $0x36c] sm:$0xf]  ;;  %v3971_v31 = vld [vmem:[#allocation11 + $0x378] sm:$0xf0]  ;;  %v4658_v19 = vld [vmem:[#allocation13 + $0xb4] sm:$0xf0] }
 0x423   :  { %v3974_v36 = vor.u32 %v4616_v30, %v3971_v31  ;;  %v4225_v20 = vld [vmem:[#allocation13 + $0x170] sm:$0xf]  ;;  %v4217_v30 = vld [vmem:[#allocation13 + $0x160] sm:$0xf]  ;;  %v4122_v31 = vor.u32 %v4656_v29, %v4121_v28 }
 0x424   :  { %v4169_v29 = vld [vmem:[#allocation13 + $0x100] sm:$0xf] }
 0x425   :  { %2219 = vmatpush.bf16.msrb.mxu3 %v3590_v33  ;;  %2231 = vmatpush.bf16.msrb.mxu0 %v3734_v34  ;;  %v4081_v33 = vld [vmem:[#allocation13 + $0x50] sm:$0xf]  ;;  %v4646_v34 = vld [vmem:[#allocation13 + $0x54] sm:$0xf0] }
 0x426   :  { %2241 = vmatpush.bf16.msrb.mxu1 %v3910_v38  ;;  %2209 = vmatpush.bf16.msra.mxu2 %v3922_v45  ;;  %v3811_v38 = vld [vmem:[#allocation11 + $0x238] sm:$0xf0]  ;;  %v4082_v41 = vor.u32 %v4646_v34, %v4081_v33  ;;  %v4572_v45 = vld [vmem:[#allocation11 + $0x20c] sm:$0xf]  ;;  %v4645_v33 = vld [vmem:[#allocation13 + $0x54] sm:$0xf] }
 0x427   :  { %2197 = vmatmul.bf16.vlgmr.msra.gmra.mxu1 %v5283_v61  ;;  %v4083_v34 = vld [vmem:[#allocation13 + $0x58] sm:$0xf0] }
 0x429   :  { %2220 = vmatpush.bf16.msrb.mxu3 %v3574_v46  ;;  %2232 = vmatpush.bf16.msrb.mxu0 %v3718_v47  ;;  %v3795_v46 = vld [vmem:[#allocation11 + $0x218] sm:$0xf0]  ;;  %v4608_v47 = vld [vmem:[#allocation11 + $0x32c] sm:$0xf] }
 0x42a   :  { %2242 = vmatpush.bf16.msrb.mxu1 %v3894_v50  ;;  %2254 = vmatpush.bf16.msrb.mxu2 %v4038_v51  ;;  %v3798_v50 = vor.u32 %v4572_v45, %v3795_v46  ;;  %v3942_v51 = vor.u32 %v4608_v47, %v3939_v48  ;;  %v4105_v45 = vld [vmem:[#allocation13 + $0x80] sm:$0xf]  ;;  %v4652_v46 = vld [vmem:[#allocation13 + $0x84] sm:$0xf0] }
 0x42b   :  { %2210 = vmatmul.bf16.vlgmr.msra.gmra.mxu2 %v5287_v10  ;;  %v4201_v47 = vld [vmem:[#allocation13 + $0x140] sm:$0xf] }
 0x42d   :  { %2221 = vmatpush.bf16.msrb.mxu3 %v3558_v59  ;;  %2233 = vmatpush.bf16.msrb.mxu0 %v3702_v60  ;;  %v4666_v59 = vld [vmem:[#allocation13 + $0xf4] sm:$0xf0]  ;;  %v4057_v60 = vld [vmem:[#allocation13 + $0x20] sm:$0xf] }
 0x42e   :  { %2243 = vmatpush.bf16.msrb.mxu1 %v3878_v63  ;;  %2255 = vmatpush.bf16.msrb.mxu2 %v4022_v1  ;;  %v4162_v62 = vor.u32 %v4666_v59, %v4161_v56  ;;  %v4153_v63 = vld [vmem:[#allocation13 + $0xe0] sm:$0xf]  ;;  %v4664_v1 = vld [vmem:[#allocation13 + $0xe4] sm:$0xf0]  ;;  %v4058_v3 = vor.u32 %v4640_v2, %v4057_v60  ;;  %v4193_v59 = vld [vmem:[#allocation13 + $0x130] sm:$0xf] }
 0x42f   :  { %v4154_v0 = vor.u32 %v4664_v1, %v4153_v63  ;;  %v4674_v60 = vld [vmem:[#allocation13 + $0x134] sm:$0xf0]  ;;  %v4059_v63 = vld [vmem:[#allocation13 + $0x28] sm:$0xf0]  ;;  %v4663_v1 = vld [vmem:[#allocation13 + $0xe4] sm:$0xf] }
 0x430   :  { %v4194_v2 = vor.u32 %v4674_v60, %v4193_v59  ;;  %v4653_v60 = vld [vmem:[#allocation13 + $0x94] sm:$0xf] }
 0x431   :  { %2222 = vmatpush.bf16.msrb.mxu3 %v3542_v9  ;;  %2234 = vmatpush.bf16.msrb.mxu0 %v3686_v11  ;;  %v4137_v9 = vld [vmem:[#allocation13 + $0xc0] sm:$0xf]  ;;  %v4042_v11 = vor.u32 %v4636_v8, %v4041_v7  ;;  %v4637_v7 = vld [vmem:[#allocation13 + $0x14] sm:$0xf]  ;;  %v4051_v8 = vld [vmem:[#allocation13 + $0x18] sm:$0xf0] }
 0x432   :  { %2244 = vmatpush.bf16.msrb.mxu1 %v3862_v12  ;;  %2256 = vmatpush.bf16.msrb.mxu2 %v4006_v13  ;;  %v4660_v12 = vld [vmem:[#allocation13 + $0xc4] sm:$0xf0] }
 0x433   :  { %v4138_v13 = vor.u32 %v4660_v12, %v4137_v9  ;;  %v4661_v9 = vld [vmem:[#allocation13 + $0xd4] sm:$0xf]  ;;  %v4147_v12 = vld [vmem:[#allocation13 + $0xd8] sm:$0xf0] }
 0x434   :  { %2223 = vmatmul.bf16.vlgmr.msrb.gmra.mxu3 %v5275_v14  ;;  %v3814_v14 = vor.u32 %v4576_v37, %v3811_v38  ;;  %v4113_v37 = vld [vmem:[#allocation13 + $0x90] sm:$0xf]  ;;  %v4654_v38 = vld [vmem:[#allocation13 + $0x94] sm:$0xf0]  ;;  %v4150_v16 = vor.u32 %v4661_v9, %v4147_v12  ;;  %v4651_v9 = vld [vmem:[#allocation13 + $0x84] sm:$0xf] }
 0x435   :  { %2669 = vmatpush.bf16.msra.mxu3 %v4098_v21  ;;  %2235 = vmatpush.bf16.msrb.mxu0 %v3670_v25  ;;  %v4130_v21 = vor.u32 %v4658_v19, %v4129_v15  ;;  %v4091_v25 = vld [vmem:[#allocation13 + $0x68] sm:$0xf0]  ;;  %v4114_v40 = vor.u32 %v4654_v38, %v4113_v37  ;;  %v4670_v15 = vld [vmem:[#allocation13 + $0x114] sm:$0xf0]  ;;  %v4675_v12 = vld [vmem:[#allocation13 + $0x144] sm:$0xf] }
 0x436   :  { %2245 = vmatpush.bf16.msrb.mxu1 %v3846_v26  ;;  %2257 = vmatpush.bf16.msrb.mxu2 %v3990_v27  ;;  %v4226_v26 = vor.u32 %v4682_v22, %v4225_v20  ;;  %v4094_v27 = vor.u32 %v4647_v23, %v4091_v25  ;;  %v4043_v22 = vld [vmem:[#allocation13 + $0x8] sm:$0xf0]  ;;  %v4659_v23 = vld [vmem:[#allocation13 + $0xc4] sm:$0xf] }
 0x438   :  { %2236 = vmatmul.bf16.vlgmr.msrb.gmra.mxu0 %v5279_v24  ;;  %v3926_v24 = vor.u32 %v4604_v52, %v3923_v53  ;;  %v4067_v52 = vld [vmem:[#allocation13 + $0x38] sm:$0xf0] }
 0x439   :  { %2670 = vmatpush.bf16.msra.mxu3 %v4090_v32  ;;  %2682 = vmatpush.bf16.msra.mxu0 %v4162_v62  ;;  %v4680_v32 = vld [vmem:[#allocation13 + $0x164] sm:$0xf0]  ;;  %v4639_v62 = vld [vmem:[#allocation13 + $0x24] sm:$0xf] }
 0x43a   :  { %2246 = vmatpush.bf16.msrb.mxu1 %v3830_v35  ;;  %2258 = vmatpush.bf16.msrb.mxu2 %v3974_v36  ;;  %v4218_v35 = vor.u32 %v4680_v32, %v4217_v30  ;;  %v4086_v36 = vor.u32 %v4645_v33, %v4083_v34  ;;  %v4668_v30 = vld [vmem:[#allocation13 + $0x104] sm:$0xf0]  ;;  %v4698_v34 = vld [vmem:[#allocation13 + $0x1f4] sm:$0xf0] }
 0x43b   :  { %v4170_v33 = vor.u32 %v4668_v30, %v4169_v29  ;;  %v4688_v29 = vld [vmem:[#allocation13 + $0x1a4] sm:$0xf0] }
 0x43d   :  { %2671 = vmatpush.bf16.msra.mxu3 %v4082_v41  ;;  %2683 = vmatpush.bf16.msra.mxu0 %v4154_v0  ;;  %v4678_v41 = vld [vmem:[#allocation13 + $0x154] sm:$0xf0]  ;;  %v4155_v0 = vld [vmem:[#allocation13 + $0xe8] sm:$0xf0] }
 0x43e   :  { %2247 = vmatpush.bf16.msrb.mxu1 %v3814_v14  ;;  %2259 = vmatpush.bf16.msrb.mxu2 %v3958_v44  ;;  %v4210_v14 = vor.u32 %v4678_v41, %v4209_v39  ;;  %v4078_v44 = vor.u32 %v4643_v42, %v4075_v43  ;;  %v4681_v39 = vld [vmem:[#allocation13 + $0x174] sm:$0xf]  ;;  %v4281_v41 = vld [vmem:[#allocation13 + $0x1e0] sm:$0xf] }
 0x441   :  { %2672 = vmatpush.bf16.msra.mxu3 %v4074_v49  ;;  %2684 = vmatpush.bf16.msra.mxu0 %v4146_v6  ;;  %v4106_v49 = vor.u32 %v4652_v46, %v4105_v45 }
 0x442   :  { %2248 = vmatpush.bf16.msrb.mxu1 %v3798_v50  ;;  %2260 = vmatpush.bf16.msrb.mxu2 %v3942_v51  ;;  %v4676_v50 = vld [vmem:[#allocation13 + $0x144] sm:$0xf0]  ;;  %v4641_v51 = vld [vmem:[#allocation13 + $0x34] sm:$0xf] }
 0x443   :  { %v4202_v53 = vor.u32 %v4676_v50, %v4201_v47  ;;  %v4655_v47 = vld [vmem:[#allocation13 + $0xa4] sm:$0xf] }
 0x444   :  { %v4679_v50 = vld [vmem:[#allocation13 + $0x164] sm:$0xf] }
 0x445   :  { %2249 = vmatmul.bf16.vlgmr.msrb.gmra.mxu1 %v5283_v61  ;;  %2673 = vmatpush.bf16.msra.mxu3 %v4066_v57  ;;  %v4638_v61 = vld [vmem:[#allocation13 + $0x14] sm:$0xf0]  ;;  %v4166_v57 = vor.u32 %v4665_v54, %v4163_v55 }
 0x446   :  { %2261 = vmatpush.bf16.msrb.mxu2 %v3926_v24  ;;  %2685 = vmatpush.bf16.msra.mxu0 %v4138_v13  ;;  %v4070_v24 = vor.u32 %v4641_v51, %v4067_v52 }
 0x447   :  { %2695 = vmatpush.bf16.msra.mxu1 %v4226_v26  ;;  %v4139_v26 = vld [vmem:[#allocation13 + $0xc8] sm:$0xf0] }
 0x449   :  { %2262 = vmatmul.bf16.vlgmr.msrb.gmra.mxu2 %v5287_v10  ;;  %2674 = vmatpush.bf16.msra.mxu3 %v4058_v3  ;;  %v4050_v10 = vor.u32 %v4638_v61, %v4049_v58  ;;  %v4062_v3 = vor.u32 %v4639_v62, %v4059_v63  ;;  %v4158_v58 = vor.u32 %v4663_v1, %v4155_v0  ;;  %v5306_v61 = vld [vmem:[%s5341_s13 + $0xb] sm:$0xf]  ;;  %v4677_v62 = vld [vmem:[#allocation13 + $0x154] sm:$0xf] }
 0x44a   :  { %2686 = vmatpush.bf16.msra.mxu0 %v4130_v21  ;;  %v1411_v17 = vperm.slane %v5306_v61, 0  ;;  %v4635_v21 = vld [vmem:[#allocation13 + $0x4] sm:$0xf] }
 0x44b   :  { %2696 = vmatpush.bf16.msra.mxu1 %v4218_v35  ;;  %v4046_v25 = vor.u32 %v4635_v21, %v4043_v22  ;;  %v4657_v35 = vld [vmem:[#allocation13 + $0xb4] sm:$0xf]  ;;  %v4690_v21 = vld [vmem:[#allocation13 + $0x1b4] sm:$0xf0] }
 0x44d   :  { %2675 = vmatpush.bf16.msra.mxu3 %v4050_v10  ;;  %v4672_v10 = vld [vmem:[#allocation13 + $0x124] sm:$0xf0] }
 0x44e   :  { %2687 = vmatpush.bf16.msra.mxu0 %v4122_v31  ;;  %v4186_v6 = vor.u32 %v4672_v10, %v4185_v4  ;;  %v4289_v31 = vld [vmem:[#allocation13 + $0x1f0] sm:$0xf]  ;;  %v1412_v4 = vperm.slane %v5306_v61, 1 }
 0x44f   :  { %2697 = vmatpush.bf16.msra.mxu1 %v4210_v14  ;;  %v4290_v37 = vor.u32 %v4698_v34, %v4289_v31  ;;  %v4696_v14 = vld [vmem:[#allocation13 + $0x1e4] sm:$0xf0] }
 0x450   :  { %v4282_v45 = vor.u32 %v4696_v14, %v4281_v41  ;;  %v4241_v41 = vld [vmem:[#allocation13 + $0x190] sm:$0xf] }
 0x451   :  { %2676 = vmatpush.bf16.msra.mxu3 %v4042_v11  ;;  %v4054_v11 = vor.u32 %v4637_v7, %v4051_v8  ;;  %2708 = vmatpush.bf16.msra.mxu2 %v4290_v37 }
 0x452   :  { %2688 = vmatpush.bf16.msra.mxu0 %v4114_v40  ;;  %v4227_v40 = vld [vmem:[#allocation13 + $0x178] sm:$0xf0] }
 0x453   :  { %2698 = vmatpush.bf16.msra.mxu1 %v4202_v53  ;;  %v4230_v43 = vor.u32 %v4681_v39, %v4227_v40  ;;  %v4219_v53 = vld [vmem:[#allocation13 + $0x168] sm:$0xf0] }
 0x454   :  { %v4222_v54 = vor.u32 %v4679_v50, %v4219_v53 }
 0x455   :  { %2721 = vmatpush.bf16.msrb.mxu3 %v4102_v18  ;;  %v4177_v18 = vld [vmem:[#allocation13 + $0x110] sm:$0xf]  ;;  %2709 = vmatpush.bf16.msra.mxu2 %v4282_v45  ;;  %v4179_v45 = vld [vmem:[#allocation13 + $0x118] sm:$0xf0] }
 0x456   :  { %2689 = vmatpush.bf16.msra.mxu0 %v4106_v49  ;;  %v4178_v20 = vor.u32 %v4670_v15, %v4177_v18  ;;  %v4123_v49 = vld [vmem:[#allocation13 + $0xa8] sm:$0xf0] }
 0x457   :  { %2699 = vmatpush.bf16.msra.mxu1 %v4194_v2  ;;  %v4126_v52 = vor.u32 %v4655_v47, %v4123_v49  ;;  %v4115_v2 = vld [vmem:[#allocation13 + $0x98] sm:$0xf0]  ;;  %v1413_v49 = vperm.slane %v5306_v61, 2 }
 0x458   :  { %v4118_v1 = vor.u32 %v4653_v60, %v4115_v2 }
 0x459   :  { %2722 = vmatpush.bf16.msrb.mxu3 %v4094_v27  ;;  %v4142_v27 = vor.u32 %v4659_v23, %v4139_v26  ;;  %v4195_v26 = vld [vmem:[#allocation13 + $0x138] sm:$0xf0] }
 0x45a   :  { %2734 = vmatpush.bf16.msrb.mxu0 %v4166_v57  ;;  %v4694_v57 = vld [vmem:[#allocation13 + $0x1d4] sm:$0xf0] }
 0x45b   :  { %2700 = vmatpush.bf16.msra.mxu1 %v4186_v6  ;;  %v4692_v6 = vld [vmem:[#allocation13 + $0x1c4] sm:$0xf0] }
 0x45d   :  { %2723 = vmatpush.bf16.msrb.mxu3 %v4086_v36  ;;  %v4131_v36 = vld [vmem:[#allocation13 + $0xb8] sm:$0xf0] }
 0x45e   :  { %2735 = vmatpush.bf16.msrb.mxu0 %v4158_v58  ;;  %v4134_v38 = vor.u32 %v4657_v35, %v4131_v36  ;;  %v4671_v35 = vld [vmem:[#allocation13 + $0x124] sm:$0xf]  ;;  %v4187_v36 = vld [vmem:[#allocation13 + $0x128] sm:$0xf0] }
 0x45f   :  { %2701 = vmatpush.bf16.msra.mxu1 %v4178_v20  ;;  %v4257_v20 = vld [vmem:[#allocation13 + $0x1b0] sm:$0xf] }
 0x460   :  { %v4258_v23 = vor.u32 %v4690_v21, %v4257_v20  ;;  %v4687_v21 = vld [vmem:[#allocation13 + $0x1a4] sm:$0xf] }
 0x461   :  { %2724 = vmatpush.bf16.msrb.mxu3 %v4078_v44 }
 0x462   :  { %2736 = vmatpush.bf16.msrb.mxu0 %v4150_v16 }
 0x463   :  { %2702 = vmatpush.bf16.msra.mxu1 %v4170_v33 }
 0x465   :  { %2725 = vmatpush.bf16.msrb.mxu3 %v4070_v24 }
 0x466   :  { %2737 = vmatpush.bf16.msrb.mxu0 %v4142_v27 }
 0x467   :  { %2747 = vmatpush.bf16.msrb.mxu1 %v4230_v43 }
 0x469   :  { %2726 = vmatpush.bf16.msrb.mxu3 %v4062_v3  ;;  %v4211_v3 = vld [vmem:[#allocation13 + $0x158] sm:$0xf0] }
 0x46a   :  { %2738 = vmatpush.bf16.msrb.mxu0 %v4134_v38  ;;  %v4214_v58 = vor.u32 %v4677_v62, %v4211_v3  ;;  %v4190_v38 = vor.u32 %v4671_v35, %v4187_v36  ;;  %v1414_v36 = vperm.slane %v5306_v61, 3 }
 0x46b   :  { %2748 = vmatpush.bf16.msrb.mxu1 %v4222_v54  ;;  %v4171_v54 = vld [vmem:[#allocation13 + $0x108] sm:$0xf0] }
 0x46d   :  { %2727 = vmatpush.bf16.msrb.mxu3 %v4054_v11  ;;  %v4107_v11 = vld [vmem:[#allocation13 + $0x88] sm:$0xf0] }
 0x46e   :  { %2739 = vmatpush.bf16.msrb.mxu0 %v4126_v52  ;;  %v4110_v16 = vor.u32 %v4651_v9, %v4107_v11  ;;  %v4684_v52 = vld [vmem:[#allocation13 + $0x184] sm:$0xf0]  ;;  %v4691_v9 = vld [vmem:[#allocation13 + $0x1c4] sm:$0xf]  ;;  %v4267_v11 = vld [vmem:[#allocation13 + $0x1c8] sm:$0xf0] }
 0x46f   :  { %2749 = vmatpush.bf16.msrb.mxu1 %v4214_v58  ;;  %v4693_v58 = vld [vmem:[#allocation13 + $0x1d4] sm:$0xf] }
 0x471   :  { %2728 = vmatpush.bf16.msrb.mxu3 %v4046_v25  ;;  %v4673_v25 = vld [vmem:[#allocation13 + $0x134] sm:$0xf] }
 0x472   :  { %2740 = vmatpush.bf16.msrb.mxu0 %v4118_v1  ;;  %v4198_v27 = vor.u32 %v4673_v25, %v4195_v26  ;;  %v4283_v1 = vld [vmem:[#allocation13 + $0x1e8] sm:$0xf0] }
 0x475   :  { %v5301_v48 = vpop.f32.mrf.mxu0 }
 0x476   :  { %2741 = vmatpush.bf16.msrb.mxu0 %v4110_v16 }
 0x477   :  { %v2068_v56 = vpop.f32.mrf.mxu3 }
 0x478   :  { %v2069_v28 = vadd.f32 %v2068_v56, %v1411_v17  ;;  %v4273_v56 = vld [vmem:[#allocation13 + $0x1d0] sm:$0xf]  ;;  %v4203_v17 = vld [vmem:[#allocation13 + $0x148] sm:$0xf0] }
 0x479   :  { %v4206_v15 = vor.u32 %v4675_v12, %v4203_v17  ;;  %v4270_v12 = vor.u32 %v4691_v9, %v4267_v11  ;;  %v4689_v17 = vld [vmem:[#allocation13 + $0x1b4] sm:$0xf]  ;;  %v4722_v11 = vld [vmem:[#allocation16 + $0x38] sm:$0xff] }
 0x47a   :  { %v2082_v44 = vadd.f32 %v5301_v48, %v2069_v28  ;;  %v4274_v48 = vor.u32 %v4694_v57, %v4273_v56  ;;  %v4249_v28 = vld [vmem:[#allocation13 + $0x1a0] sm:$0xf] }
 0x47b   :  { %2750 = vmatpush.bf16.msrb.mxu1 %v4206_v15  ;;  %v4250_v33 = vor.u32 %v4688_v29, %v4249_v28  ;;  %v4243_v28 = vld [vmem:[#allocation13 + $0x198] sm:$0xf0] }
 0x47c   :  { %2710 = vmatpush.bf16.msra.mxu2 %v4274_v48  ;;  %v4291_v48 = vld [vmem:[#allocation13 + $0x1f8] sm:$0xf0] }
 0x47d   :  { %v2083_v5 = vpop.f32.mrf.mxu0 }
 0x47e   :  { %v4265_v5 = vld [vmem:[#allocation13 + $0x1c0] sm:$0xf] }
 0x47f   :  { %v2070_v13 = vpop.f32.mrf.mxu3  ;;  %v4266_v8 = vor.u32 %v4692_v6, %v4265_v5  ;;  %2751 = vmatpush.bf16.msrb.mxu1 %v4198_v27  ;;  %v4685_v27 = vld [vmem:[#allocation13 + $0x194] sm:$0xf] }
 0x480   :  { %v4246_v29 = vor.u32 %v4685_v27, %v4243_v28 }
 0x481   :  { %v2094_v19 = vpop.f32.mrf.mxu1  ;;  %2711 = vmatpush.bf16.msra.mxu2 %v4266_v8 }
 0x482   :  { %v2095_v51 = vadd.f32 %v2094_v19, %v2082_v44  ;;  %v4669_v44 = vld [vmem:[#allocation13 + $0x114] sm:$0xf] }
 0x483   :  { %2752 = vmatpush.bf16.msrb.mxu1 %v4190_v38 }
 0x485   :  { %v5309_v32 = vpop.f32.mrf.mxu0  ;;  %2712 = vmatpush.bf16.msra.mxu2 %v4258_v23 }
 0x487   :  { %v2120_v42 = vpop.f32.mrf.mxu3 }
 0x488   :  { %v2121_v19 = vadd.f32 %v2120_v42, %v1412_v4  ;;  %v4686_v42 = vld [vmem:[#allocation13 + $0x194] sm:$0xf0]  ;;  %v4275_v4 = vld [vmem:[#allocation13 + $0x1d8] sm:$0xf0] }
 0x489   :  { %v2096_v46 = vpop.f32.mrf.mxu1  ;;  %2713 = vmatpush.bf16.msra.mxu2 %v4250_v33  ;;  %v4242_v14 = vor.u32 %v4686_v42, %v4241_v41  ;;  %v4278_v5 = vor.u32 %v4693_v58, %v4275_v4  ;;  %v4235_v33 = vld [vmem:[#allocation13 + $0x188] sm:$0xf0]  ;;  %v4710_v58 = vld [vmem:[#allocation14 + $0x58] sm:$0xff]  ;;  %v4709_v4 = vld [vmem:[#allocation14 + $0x50] sm:$0xff] }
 0x48a   :  { %v2134_v31 = vadd.f32 %v5309_v32, %v2121_v19  ;;  %v4182_v32 = vor.u32 %v4669_v44, %v4179_v45 }
 0x48b   :  { %v2107_v24 = vpop.f32.mrf.mxu2 }
 0x48c   :  { %v2108_v55 = vadd.f32 %v2107_v24, %v2095_v51  ;;  %v4233_v51 = vld [vmem:[#allocation13 + $0x180] sm:$0xf]  ;;  %2753 = vmatpush.bf16.msrb.mxu1 %v4182_v32  ;;  %v4667_v24 = vld [vmem:[#allocation13 + $0x104] sm:$0xf] }
 0x48d   :  { %v2135_v59 = vpop.f32.mrf.mxu0  ;;  %2714 = vmatpush.bf16.msra.mxu2 %v4242_v14  ;;  %v4234_v53 = vor.u32 %v4684_v52, %v4233_v51  ;;  %v4704_v51 = vld [vmem:[#allocation14 + $0x28] sm:$0xff] }
 0x48e   :  { %v2267_v63 = vmul.f32 0.2, %v2108_v55  ;;  %v4174_v59 = vor.u32 %v4667_v24, %v4171_v54  ;;  %v4703_v24 = vld [vmem:[#allocation14 + $0x20] sm:$0xff]  ;;  %v4714_v54 = vld [vmem:[#allocation14 + $0x78] sm:$0xff] }
 0x48f   :  { %v2122_v0 = vpop.f32.mrf.mxu3 }
 0x490   :  { %v2271_v10 = vmax.f32 %v2108_v55, %v2267_v63  ;;  %v4697_v55 = vld [vmem:[#allocation13 + $0x1f4] sm:$0xf]  ;;  %2754 = vmatpush.bf16.msrb.mxu1 %v4174_v59  ;;  %v4695_v63 = vld [vmem:[#allocation13 + $0x1e4] sm:$0xf] }
 0x491   :  { %v2146_v7 = vpop.f32.mrf.mxu1  ;;  %v4294_v2 = vor.u32 %v4697_v55, %v4291_v48  ;;  %2715 = vmatpush.bf16.msra.mxu2 %v4234_v53  ;;  %v4286_v3 = vor.u32 %v4695_v63, %v4283_v1  ;;  %v4702_v55 = vld [vmem:[#allocation14 + $0x18] sm:$0xff]  ;;  %v4701_v59 = vld [vmem:[#allocation14 + $0x10] sm:$0xff] }
 0x492   :  { %v2276_v13 = vpack.c.bf16 %v2271_v10, %v2271_v10  ;;  %v2147_v37 = vadd.f32 %v2146_v7, %v2134_v31  ;;  %v4683_v31 = vld [vmem:[#allocation13 + $0x184] sm:$0xf] }
 0x493   :  { %v2109_v18 = vpop.f32.mrf.mxu2  ;;  %v4238_v35 = vor.u32 %v4683_v31, %v4235_v33 }
 0x494   :  { %2677 = vmatmul.bf16.vlgmr.msra.gmra.mxu3 %v2276_v13  ;;  %v4259_v18 = vld [vmem:[#allocation13 + $0x1b8] sm:$0xf0] }
 0x495   :  { %v2185_v22 = vpop.f32.mrf.mxu0  ;;  %2760 = vmatpush.bf16.msrb.mxu2 %v4294_v2  ;;  %v4262_v15 = vor.u32 %v4689_v17, %v4259_v18  ;;  %v4700_v2 = vld [vmem:[#allocation14 + $0x8] sm:$0xff] }
 0x496   :  { %v4720_v18 = vld [vmem:[#allocation16 + $0x28] sm:$0xff] }
 0x497   :  { %v2172_v30 = vpop.f32.mrf.mxu3 }
 0x498   :  { %v2173_v62 = vadd.f32 %v2172_v30, %v1413_v49 }
 0x499   :  { %v2148_v34 = vpop.f32.mrf.mxu1  ;;  %2761 = vmatpush.bf16.msrb.mxu2 %v4286_v3  ;;  %v4699_v3 = vld [vmem:[#allocation14] sm:$0xff] }
 0x49a   :  { %v2186_v0 = vadd.f32 %v2185_v22, %v2173_v62  ;;  %v4251_v22 = vld [vmem:[#allocation13 + $0x1a8] sm:$0xf0] }
 0x49b   :  { %v2159_v39 = vpop.f32.mrf.mxu2  ;;  %v4254_v26 = vor.u32 %v4687_v21, %v4251_v22  ;;  %v4712_v62 = vld [vmem:[#allocation14 + $0x68] sm:$0xff] }
 0x49c   :  { %v2160_v40 = vadd.f32 %v2159_v39, %v2147_v37 }
 0x49d   :  { %v2187_v43 = vpop.f32.mrf.mxu0  ;;  %2762 = vmatpush.bf16.msrb.mxu2 %v4278_v5  ;;  %v4708_v5 = vld [vmem:[#allocation14 + $0x48] sm:$0xff] }
 0x49e   :  { %v2268_v46 = vmul.f32 0.2, %v2160_v40 }
 0x49f   :  { %v2174_v47 = vpop.f32.mrf.mxu3 }
 0x4a0   :  { %v2272_v50 = vmax.f32 %v2160_v40, %v2268_v46  ;;  %v4706_v47 = vld [vmem:[#allocation14 + $0x38] sm:$0xff] }
 0x4a1   :  { %2763 = vmatpush.bf16.msrb.mxu2 %v4270_v12  ;;  %2911 = vmatpush.bf16.msra.mxu3 %v4706_v47 }
 0x4a2   :  { %v2277_v56 = vpack.c.bf16 %v2272_v50, %v2272_v50  ;;  %v4705_v50 = vld [vmem:[#allocation14 + $0x30] sm:$0xff] }
 0x4a3   :  { %v2161_v60 = vpop.f32.mrf.mxu2 }
 0x4a4   :  { %v2198_v57 = vpop.f32.mrf.mxu1  ;;  %2690 = vmatmul.bf16.vlgmr.msra.gmra.mxu0 %v2277_v56  ;;  %2729 = vmatmul.bf16.vlgmr.msrb.gmra.mxu3 %v2276_v13 }
 0x4a5   :  { %v2199_v6 = vadd.f32 %v2198_v57, %v2186_v0  ;;  %2764 = vmatpush.bf16.msrb.mxu2 %v4262_v15  ;;  %2912 = vmatpush.bf16.msra.mxu3 %v4705_v50  ;;  %v4711_v0 = vld [vmem:[#allocation14 + $0x60] sm:$0xff] }
 0x4a6   :  { %2924 = vmatpush.bf16.msra.mxu0 %v4714_v54 }
 0x4a9   :  { %2765 = vmatpush.bf16.msrb.mxu2 %v4254_v26  ;;  %2913 = vmatpush.bf16.msra.mxu3 %v4704_v51 }
 0x4ac   :  { %v2200_v10 = vpop.f32.mrf.mxu1 }
 0x4ad   :  { %2766 = vmatpush.bf16.msrb.mxu2 %v4246_v29  ;;  %2914 = vmatpush.bf16.msra.mxu3 %v4703_v24 }
 0x4ae   :  { %v2211_v7 = vpop.f32.mrf.mxu2 }
 0x4af   :  { %v2212_v8 = vadd.f32 %v2211_v7, %v2199_v6  ;;  %v2275_v6 = vld [vmem:[%s5341_s13 + $0xf] sm:$0x3] }
 0x4b0   :  { %v2345_v9 = vperm.slane %v2275_v6, 0  ;;  %v2346_v22 = vperm.slane %v2275_v6, 1 }
 0x4b1   :  { %v2269_v13 = vmul.f32 0.2, %v2212_v8  ;;  %2767 = vmatpush.bf16.msrb.mxu2 %v4238_v35  ;;  %2915 = vmatpush.bf16.msra.mxu3 %v4702_v55 }
 0x4b3   :  { %v2273_v16 = vmax.f32 %v2212_v8, %v2269_v13  ;;  %v4707_v8 = vld [vmem:[#allocation14 + $0x40] sm:$0xff]  ;;  %v4721_v13 = vld [vmem:[#allocation16 + $0x30] sm:$0xff] }
 0x4b4   :  { %2742 = vmatmul.bf16.vlgmr.msrb.gmra.mxu0 %v2277_v56  ;;  %v4713_v56 = vld [vmem:[#allocation14 + $0x70] sm:$0xff] }
 0x4b5   :  { %v2278_v19 = vpack.c.bf16 %v2273_v16, %v2273_v16  ;;  %v2237_v20 = vpop.f32.mrf.mxu0  ;;  %2925 = vmatpush.bf16.msra.mxu0 %v4713_v56  ;;  %2916 = vmatpush.bf16.msra.mxu3 %v4701_v59 }
 0x4b6   :  { %v2213_v23 = vpop.f32.mrf.mxu2 }
 0x4b7   :  { %v2224_v25 = vpop.f32.mrf.mxu3  ;;  %2703 = vmatmul.bf16.vlgmr.msra.gmra.mxu1 %v2278_v19 }
 0x4b8   :  { %v2225_v38 = vadd.f32 %v2224_v25, %v1414_v36  ;;  %3008 = vmatpush.bf16.msra.mxu1 %v4722_v11  ;;  %v4719_v36 = vld [vmem:[#allocation16 + $0x20] sm:$0xff] }
 0x4b9   :  { %2917 = vmatpush.bf16.msra.mxu3 %v4700_v2  ;;  %2926 = vmatpush.bf16.msra.mxu0 %v4712_v62 }
 0x4ba   :  { %v2238_v39 = vadd.f32 %v2237_v20, %v2225_v38  ;;  %v4717_v38 = vld [vmem:[#allocation16 + $0x10] sm:$0xff] }
 0x4bc   :  { %3009 = vmatpush.bf16.msra.mxu1 %v4721_v13 }
 0x4bd   :  { %v2239_v30 = vpop.f32.mrf.mxu0  ;;  %2918 = vmatpush.bf16.msra.mxu3 %v4699_v3  ;;  %2927 = vmatpush.bf16.msra.mxu0 %v4711_v0 }
 0x4bf   :  { %v2226_v34 = vpop.f32.mrf.mxu3 }
 0x4c0   :  { %3010 = vmatpush.bf16.msra.mxu1 %v4720_v18 }
 0x4c1   :  { %2928 = vmatpush.bf16.msra.mxu0 %v4710_v58 }
 0x4c2   :  { %v2250_v37 = vpop.f32.mrf.mxu1 }
 0x4c3   :  { %v2251_v41 = vadd.f32 %v2250_v37, %v2238_v39  ;;  %v4718_v37 = vld [vmem:[#allocation16 + $0x18] sm:$0xff]  ;;  %v4716_v39 = vld [vmem:[#allocation16 + $0x8] sm:$0xff] }
 0x4c4   :  { %3011 = vmatpush.bf16.msra.mxu1 %v4719_v36 }
 0x4c5   :  { %2929 = vmatpush.bf16.msra.mxu0 %v4709_v4 }
 0x4c7   :  { %2755 = vmatmul.bf16.vlgmr.msrb.gmra.mxu1 %v2278_v19 }
 0x4c8   :  { %3012 = vmatpush.bf16.msra.mxu1 %v4718_v37 }
 0x4c9   :  { %2930 = vmatpush.bf16.msra.mxu0 %v4708_v5 }
 0x4ca   :  { %v2252_v40 = vpop.f32.mrf.mxu1 }
 0x4cb   :  { %v4715_v40 = vld [vmem:[#allocation16] sm:$0xff] }
 0x4cc   :  { %v2263_v42 = vpop.f32.mrf.mxu2  ;;  %3013 = vmatpush.bf16.msra.mxu1 %v4717_v38 }
 0x4cd   :  { %v2264_v43 = vadd.f32 %v2263_v42, %v2251_v41  ;;  %2931 = vmatpush.bf16.msra.mxu0 %v4707_v8  ;;  %v4742_v42 = vld [vmem:[%s5341_s13 + $0x11] ss:$0 sm:$0xff] }
 0x4cf   :  { %v2270_v14 = vmul.f32 0.2, %v2264_v43 }
 0x4d0   :  { %3014 = vmatpush.bf16.msra.mxu1 %v4716_v39 }
 0x4d1   :  { %v2274_v44 = vmax.f32 %v2264_v43, %v2270_v14 }
 0x4d3   :  { %v2279_v45 = vpack.c.bf16 %v2274_v44, %v2274_v44 }
 0x4d4   :  { %v2265_v46 = vpop.f32.mrf.mxu2  ;;  %3015 = vmatpush.bf16.msra.mxu1 %v4715_v40 }
 0x4d5   :  { %2716 = vmatmul.bf16.vlgmr.msra.gmra.mxu2 %v2279_v45 }
 0x4e5   :  { %2768 = vmatmul.bf16.vlgmr.msrb.gmra.mxu2 %v2279_v45 }
 0x517   :  { %v2678_v32 = vpop.f32.mrf.mxu3 }
 0x518   :  { %v2679_v12 = vadd.f32 %v2678_v32, %v2345_v9 }
 0x51f   :  { %v2680_v49 = vpop.f32.mrf.mxu3 }
 0x521   :  { %v2691_v61 = vpop.f32.mrf.mxu0 }
 0x522   :  { %v2692_v16 = vadd.f32 %v2691_v61, %v2679_v12  ;;  %v4743_v61 = vld [vmem:[%s5341_s13 + $0x12] ss:$0 sm:$0xff] }
 0x527   :  { %v2730_v52 = vpop.f32.mrf.mxu3 }
 0x528   :  { %v2731_v26 = vadd.f32 %v2730_v52, %v2346_v22 }
 0x529   :  { %v2693_v53 = vpop.f32.mrf.mxu0 }
 0x52f   :  { %v2732_v57 = vpop.f32.mrf.mxu3 }
 0x531   :  { %v2743_v48 = vpop.f32.mrf.mxu0 }
 0x532   :  { %v2744_v27 = vadd.f32 %v2743_v48, %v2731_v26 }
 0x534   :  { %v2704_v60 = vpop.f32.mrf.mxu1 }
 0x535   :  { %v2705_v17 = vadd.f32 %v2704_v60, %v2692_v16 }
 0x539   :  { %v2745_v63 = vpop.f32.mrf.mxu0 }
 0x53c   :  { %v2706_v1 = vpop.f32.mrf.mxu1 }
 0x544   :  { %v2756_v10 = vpop.f32.mrf.mxu1 }
 0x545   :  { %v2757_v28 = vadd.f32 %v2756_v10, %v2744_v27 }
 0x54c   :  { %v2758_v7 = vpop.f32.mrf.mxu1 }
 0x558   :  { %v2717_v15 = vpop.f32.mrf.mxu2 }
 0x559   :  { %v2718_v19 = vadd.f32 %v2717_v15, %v2705_v17 }
 0x55b   :  { %v2773_v20 = vmul.f32 0.2, %v2718_v19 }
 0x55d   :  { %v2775_v21 = vmax.f32 %v2718_v19, %v2773_v20 }
 0x55f   :  { %v2778_v23 = vpack.c.bf16 %v2775_v21, %v2775_v21 }
 0x560   :  { %v2719_v25 = vpop.f32.mrf.mxu2 }
 0x561   :  { %2919 = vmatmul.bf16.vlgmr.msra.gmra.mxu3 %v2778_v23 }
 0x568   :  { %v2769_v29 = vpop.f32.mrf.mxu2 }
 0x569   :  { %v2770_v30 = vadd.f32 %v2769_v29, %v2757_v28 }
 0x56b   :  { %v2774_v31 = vmul.f32 0.2, %v2770_v30 }
 0x56d   :  { %v2776_v33 = vmax.f32 %v2770_v30, %v2774_v31 }
 0x56f   :  { %v2779_v34 = vpack.c.bf16 %v2776_v33, %v2776_v33 }
 0x570   :  { %v2771_v35 = vpop.f32.mrf.mxu2 }
 0x571   :  { %2932 = vmatmul.bf16.vlgmr.msra.gmra.mxu0 %v2779_v34 }
 0x5e4   :  { %v2920_v41 = vpop.f32.mrf.mxu3 }
 0x5e5   :  { %v2921_v14 = vadd.f32 %v4742_v42, %v2920_v41 }
 0x5ec   :  { %v2922_v43 = vpop.f32.mrf.mxu3 }
 0x5ee   :  { %v2933_v44 = vpop.f32.mrf.mxu0 }
 0x5ef   :  { %v2934_v45 = vadd.f32 %v2933_v44, %v2921_v14 }
 0x5f1   :  { %v2937_v46 = vmul.f32 0.2, %v2934_v45 }
 0x5f3   :  { %v2938_v32 = vmax.f32 %v2934_v45, %v2937_v46 }
 0x5f5   :  { %v2940_v47 = vpack.c.bf16 %v2938_v32, %v2938_v32 }
 0x5f6   :  { %v2935_v49 = vpop.f32.mrf.mxu0 }
 0x5f7   :  { %3016 = vmatmul.bf16.vlgmr.msra.gmra.mxu1 %v2940_v47 }
 0x674   :  { %v3017_v50 = vpop.f32.mrf.mxu1 }
 0x675   :  { %v3018_v51 = vadd.f32 %v4743_v61, %v3017_v50 }
 0x677   :  { %v3021_v52 = vmul.f32 %v3018_v51, %v3018_v51 }
 0x679   :  { %3022 = vadd.xlane.f32.xlu0 %v3021_v52 }
 0x67c   :  { %v3019_v53 = vpop.f32.mrf.mxu1 }
 0x6ec   :  { %v3023_v24 = vpop.xlane.xlu0 %3022 }
 0x6ed   :  { %v3024_v54 = vmax.f32 %v3023_v24, 1e-24 }
 0x6ef   :  { %4746 = vrsqrt.f32 %v3024_v54  ;;  %vm3031_vm7 = vweird.f32 %v3024_v54 }
 0x6f5   :  { %v4747_v55 = vpop.eup %4746 }
 0x6f6   :  { %v3026_v56 = vmul.f32 %v4747_v55, %v3024_v54  ;;  %vm3032_vm6 = vweird.f32 %v4747_v55 }
 0x6f7   :  { %vm3033_vm8 = vmor %vm3031_vm7, %vm3032_vm6 }
 0x6f8   :  { %v3027_v57 = vmul.f32 %v4747_v55, %v3026_v56 }
 0x6fa   :  { %v3028_v59 = vmul.f32 0.5, %v3027_v57 }
 0x6fc   :  { %v3029_v48 = vsub.f32 1.5, %v3028_v59 }
 0x6fe   :  { %v3030_v60 = vmul.f32 %v4747_v55, %v3029_v48 }
 0x700   :  { %v3034_v2 = vsel %vm3033_vm8, %v4747_v55, %v3030_v60 }
 0x701   :  { %v3035_v62 = vmul.f32 %v3034_v2, %v3018_v51 }
 0x703   :  { %3036 = vst [vmem:[#allocation17] sm:$0xff] %v3035_v62 }
 0x704   :  { %3047 = dma.vmem_to_hbm [thread:$0]  %s3043_s25, 128, %s3045_s10, [#allocation4]  }
 0x705   :  { %4998 = dma.done.wait [#allocation4], 128  }
 0x706   :  { %4999 = vsyncadd [#allocation4], 4294967168 }
 0x707   :  { %3052 = vsyncpa [#allocation3], 1 }
 0x708   :  { %3053 = vsyncpa [#allocation6], 1 }
 0x709   :  { %3054 = vsyncpa [#allocation9], 1 }
 0x70a   :  { %3055 = vsyncpa [#allocation12], 1 }
 0x70b   :  { %3056 = vsyncpa [#allocation15], 1 }
 0x70c   :  { %3057 = vsyncpa [#allocation4], 1 }

</bundles_post_ra>
